<compile_context>
chip_gen: v7x
topology: tpu7x:2x2x1
jax: 0.10.0
libtpu: 0.0.40
codegen_flags: <defaults>
</compile_context>

<pallas_src>
import numpy as np
import jax
import jax.numpy as jnp
from jax import lax
from jax.experimental import pallas as pl
from jax.experimental.pallas import tpu as pltpu

# ----------------------------- configuration --------------------------------
N, C, H, W = 2, 4, 16, 16          # small shapes consistent with the module
N_PATCHES = 4                      # image 16x16 -> 4x4 patches of size 4
N_BLOCKS = 2
HIDDEN_D = 32
N_HEADS = 2
MLP_RATIO = 4
OUT_D = 1                          # unused: PyTorch forward returns before the head

PATCH = H // N_PATCHES
INPUT_D = C * PATCH * PATCH        # 64
INPUT_D_PAD = 128                  # lane-padded input dim (holds cls indicator col)
SEQ = N_PATCHES ** 2 + 1           # 17 (class token + patches)
SEQ_PAD = 24                       # sublane-aligned sequence length
D_HEAD = HIDDEN_D // N_HEADS       # 16
MLP_D = MLP_RATIO * HIDDEN_D       # 128
EPS = 1e-5
ROWS = N * SEQ_PAD                 # 48 rows held in VMEM for the whole batch


# --------------------------- positional embeddings ---------------------------
def get_positional_embeddings(sequence_length, d):
    result = np.ones((sequence_length, d), dtype=np.float32)
    for i in range(sequence_length):
        for j in range(d):
            if j % 2 == 0:
                result[i, j] = np.sin(i / 10000 ** (j / d))
            else:
                result[i, j] = np.cos(i / 10000 ** ((j - 1) / d))
    return result


# ------------------------------ Pallas kernel --------------------------------
def vit_kernel(patches_ref, lm_w_ref, pos_ref, mask_ref,
               qkv_w_ref, qkv_b_ref, w1_ref, b1_ref, w2_ref, b2_ref,
               out_ref):
    f32 = jnp.float32
    bf16 = jnp.bfloat16

    def layernorm(v):
        # Affine (gamma, beta) is folded into the following weights host-side.
        mu = jnp.mean(v, axis=-1, keepdims=True)
        var = jnp.mean((v - mu) ** 2, axis=-1, keepdims=True)
        return (v - mu) * lax.rsqrt(var + EPS)

    # Patch projection (bf16 operands, f32 accumulation).  The cls token is
    # produced by the augmented indicator column baked into lm_w host-side,
    # and the lm bias is folded into pos_ref, so no concatenate / bias add.
    x = jnp.dot(patches_ref[...], lm_w_ref[...], preferred_element_type=f32)
    x = x + pos_ref[...]                                        # (ROWS, HIDDEN) f32

    # Block-diagonal batch mask + padded-key mask, precomputed host-side.
    mask = mask_ref[...]                                        # (ROWS, ROWS) f32

    for blk in range(N_BLOCKS):                                 # statically unrolled
        # ---- Multi-head self-attention on norm1(x), fused QKV projection ----
        y = layernorm(x).astype(bf16)
        qkv = jnp.dot(y, qkv_w_ref[blk],
                      preferred_element_type=f32) + qkv_b_ref[blk]   # (ROWS, 96) f32

        heads = []
        for hh in range(N_HEADS):
            c0 = hh * D_HEAD
            q = qkv[:, c0:c0 + D_HEAD].astype(bf16)             # 1/sqrt(d) pre-folded
            k = qkv[:, HIDDEN_D + c0:HIDDEN_D + c0 + D_HEAD].astype(bf16)
            v = qkv[:, 2 * HIDDEN_D + c0:2 * HIDDEN_D + c0 + D_HEAD].astype(bf16)
            # MXU-native transposed-RHS contraction: S = Q @ K^T over the slab.
            s = lax.dot_general(q, k, (((1,), (1,)), ((), ())),
                                preferred_element_type=f32) + mask
            s = s - jnp.max(s, axis=-1, keepdims=True)
            e = jnp.exp(s)
            att = e * pl.reciprocal(jnp.sum(e, axis=-1, keepdims=True),
                                    approx=True)
            heads.append(jnp.dot(att.astype(bf16), v,
                                 preferred_element_type=f32))   # (ROWS, D_HEAD)

        # Combine the head outputs in registers (single 32-lane group).
        x = x + jnp.concatenate(heads, axis=-1)

        # ---- MLP on norm2(x) (affine folded into W1/b1 host-side) ----
        z = layernorm(x).astype(bf16)
        h1 = jnp.dot(z, w1_ref[blk],
                     preferred_element_type=f32) + b1_ref[blk]
        h1 = jax.nn.gelu(h1, approximate=True)                  # tanh -> EUP slot
        x = x + jnp.dot(h1.astype(bf16), w2_ref[blk],
                        preferred_element_type=f32) + b2_ref[blk]

    out_ref[...] = x.astype(out_ref.dtype)


# ------------------------------- wrapper --------------------------------------
def patchify_jax(images):
    # Matches PyTorch patchify: flatten order is (c, patch_h, patch_w).
    p = images.reshape(N, C, N_PATCHES, PATCH, N_PATCHES, PATCH)
    p = p.transpose(0, 2, 4, 1, 3, 5)
    return p.reshape(N, N_PATCHES ** 2, INPUT_D)


def patchify_aug(images):
    # Augmented, sublane-padded layout: row 0 of each batch element is the cls
    # indicator (1.0 in column INPUT_D), rows 1..16 the patches, rows 17..23
    # zero padding. Columns padded to 128 lanes.  Cast to bf16 (MXU operand).
    p = patchify_jax(images)
    aug = jnp.zeros((N, SEQ_PAD, INPUT_D_PAD), jnp.float32)
    aug = aug.at[:, 1:SEQ, :INPUT_D].set(p)
    aug = aug.at[:, 0, INPUT_D].set(1.0)
    return aug.reshape(ROWS, INPUT_D_PAD).astype(jnp.bfloat16)


def prepare_kernel_params(params):
    """Host-side layout work: pre-transposed lane-dense bf16 weights, fused
    block-diagonal QKV with 1/sqrt(d_head) folded in, LayerNorm affine folded
    into the following weights/biases, lm bias folded into the positional
    slab, cls token folded into an augmented projection column, and the
    block-diagonal batch/key mask for slab attention."""
    (lm_w, lm_b, cls_tok, pos, ln_w, ln_b,
     qkv_w, qkv_b, w1, b1, w2, b2) = [np.asarray(p, np.float32) for p in params]

    scale = 1.0 / np.sqrt(D_HEAD)

    # Patch projection weight, (in, out) layout, with cls-indicator column.
    lm_w_aug = np.zeros((INPUT_D_PAD, HIDDEN_D), np.float32)
    lm_w_aug[:INPUT_D] = lm_w.T
    lm_w_aug[INPUT_D] = cls_tok[0] - lm_b[0]           # cls indicator column

    # Fused block-diagonal QKV weight/bias, q-scale folded in.
    wqkv = np.zeros((N_BLOCKS, HIDDEN_D, 3 * HIDDEN_D), np.float32)
    bqkv = np.zeros((N_BLOCKS, 1, 3 * HIDDEN_D), np.float32)
    for blk in range(N_BLOCKS):
        for hh in range(N_HEADS):
            r = slice(hh * D_HEAD, (hh + 1) * D_HEAD)
            for i, sc in ((0, scale), (1, 1.0), (2, 1.0)):      # q, k, v
                c = slice(i * HIDDEN_D + hh * D_HEAD,
                          i * HIDDEN_D + (hh + 1) * D_HEAD)
                wqkv[blk, r, c] = qkv_w[blk, i, hh].T * sc
                bqkv[blk, 0, c] = qkv_b[blk, i, hh, 0] * sc

    # MLP weights in (in, out) layout.
    w1_t = np.transpose(w1, (0, 2, 1)).copy()          # (N_BLOCKS, HIDDEN, MLP)
    w2_t = np.transpose(w2, (0, 2, 1)).copy()          # (N_BLOCKS, MLP, HIDDEN)
    b1_f = b1.copy()
    b2_f = b2.copy()

    # Fold LayerNorm affine into the following matmul:  (u*g + be) @ W + b
    #   = u @ (diag(g) W) + (be @ W + b).  Bias fold uses the un-scaled W.
    for blk in range(N_BLOCKS):
        g1, be1 = ln_w[blk, 0, 0], ln_b[blk, 0, 0]
        bqkv[blk, 0] = be1 @ wqkv[blk] + bqkv[blk, 0]
        wqkv[blk] = g1[:, None] * wqkv[blk]
        g2, be2 = ln_w[blk, 1, 0], ln_b[blk, 1, 0]
        b1_f[blk, 0] = be2 @ w1_t[blk] + b1_f[blk, 0]
        w1_t[blk] = g2[:, None] * w1_t[blk]

    # Positional embeddings tiled per batch element; lm bias folded in on the
    # valid rows; padded rows stay exactly zero.
    pos_pad = np.zeros((SEQ_PAD, HIDDEN_D), np.float32)
    pos_pad[:SEQ] = pos + lm_b
    pos_full = np.tile(pos_pad, (N, 1))                # (ROWS, HIDDEN)

    # Block-diagonal batch mask merged with the padded-key mask (f32; -1e30 is
    # added to f32 scores -- keep the mask itself in f32, not bf16).
    mask = np.full((ROWS, ROWS), -1e30, np.float32)
    for b in range(N):
        r = slice(b * SEQ_PAD, (b + 1) * SEQ_PAD)
        c = slice(b * SEQ_PAD, b * SEQ_PAD + SEQ)
        mask[r, c] = 0.0

    bf = lambda a: jnp.asarray(a, jnp.bfloat16)
    f32 = lambda a: jnp.asarray(a, jnp.float32)
    return (bf(lm_w_aug), f32(pos_full), f32(mask),
            bf(wqkv), f32(bqkv), bf(w1_t), f32(b1_f), bf(w2_t), f32(b2_f))


def vit_forward(images, kparams):
    (lm_w_aug, pos_full, mask,
     wqkv, bqkv, w1_t, b1, w2_t, b2) = kparams

    patches = patchify_aug(images)

    def full(shape):
        nd = len(shape)
        return pl.BlockSpec(shape, lambda i, _nd=nd: (0,) * _nd)

    grid_spec = pltpu.PrefetchScalarGridSpec(
        num_scalar_prefetch=0,
        grid=(1,),                                     # batch folded into rows
        in_specs=[
            full((ROWS, INPUT_D_PAD)),                 # augmented patches (bf16)
            full((INPUT_D_PAD, HIDDEN_D)),             # lm weight (in,out) + cls col
            full((ROWS, HIDDEN_D)),                    # pos emb (+ lm bias folded)
            full((ROWS, ROWS)),                        # batch/key additive mask
            full((N_BLOCKS, HIDDEN_D, 3 * HIDDEN_D)),  # fused block-diag QKV weight
            full((N_BLOCKS, 1, 3 * HIDDEN_D)),         # fused QKV bias (+LN beta)
            full((N_BLOCKS, HIDDEN_D, MLP_D)),         # mlp W1 (in,out) (+LN gamma)
            full((N_BLOCKS, 1, MLP_D)),                # mlp b1 (+LN beta)
            full((N_BLOCKS, MLP_D, HIDDEN_D)),         # mlp W2 (in,out)
            full((N_BLOCKS, 1, HIDDEN_D)),             # mlp b2
        ],
        out_specs=full((ROWS, HIDDEN_D)),
        scratch_shapes=[],
    )

    out = pl.pallas_call(
        vit_kernel,
        out_shape=jax.ShapeDtypeStruct((ROWS, HIDDEN_D), jnp.float32),
        grid_spec=grid_spec,
        compiler_params=pltpu.CompilerParams(
            dimension_semantics=("arbitrary",)),
    )(patches, lm_w_aug, pos_full, mask,
      wqkv, bqkv, w1_t, b1, w2_t, b2)

    return out.reshape(N, SEQ_PAD, HIDDEN_D)[:, :SEQ]


# ------------------------- pure-JAX reference (check) -------------------------
def vit_reference(images, params):
    (lm_w, lm_b, cls_tok, pos, ln_w, ln_b,
     qkv_w, qkv_b, w1, b1, w2, b2) = params
    patches = patchify_jax(images)
    tokens = patches @ lm_w.T + lm_b
    cls = jnp.broadcast_to(cls_tok[None], (N, 1, HIDDEN_D))
    x = jnp.concatenate([cls, tokens], axis=1) + pos[None]

    def ln(v, g, b):
        mu = v.mean(-1, keepdims=True)
        var = ((v - mu) ** 2).mean(-1, keepdims=True)
        return (v - mu) * lax.rsqrt(var + EPS) * g + b

    for blk in range(N_BLOCKS):
        y = ln(x, ln_w[blk, 0], ln_b[blk, 0])
        heads = []
        for hh in range(N_HEADS):
            seq = y[..., hh * D_HEAD:(hh + 1) * D_HEAD]
            q = seq @ qkv_w[blk, 0, hh].T + qkv_b[blk, 0, hh]
            k = seq @ qkv_w[blk, 1, hh].T + qkv_b[blk, 1, hh]
            v = seq @ qkv_w[blk, 2, hh].T + qkv_b[blk, 2, hh]
            s = q @ jnp.swapaxes(k, -1, -2) / (D_HEAD ** 0.5)
            att = jax.nn.softmax(s, axis=-1)
            heads.append(att @ v)
        x = x + jnp.concatenate(heads, axis=-1)
        z = ln(x, ln_w[blk, 1], ln_b[blk, 1])
        h1 = z @ w1[blk].T + b1[blk]
        h1 = 0.5 * h1 * (1.0 + lax.erf(h1 / jnp.sqrt(2.0)))     # exact GELU
        x = x + h1 @ w2[blk].T + b2[blk]
    return x


# ------------------------------ parameter init --------------------------------
def init_params(key):
    def init_linear(k, out_d, in_d):
        k1, k2 = jax.random.split(k)
        bound = 1.0 / np.sqrt(in_d)
        w = jax.random.uniform(k1, (out_d, in_d), jnp.float32, -bound, bound)
        b = jax.random.uniform(k2, (out_d,), jnp.float32, -bound, bound)
        return np.asarray(w), np.asarray(b)

    keys = iter(jax.random.split(key, 64))

    lm_w_, lm_b_ = init_linear(next(keys), HIDDEN_D, INPUT_D)
    lm_b_ = lm_b_.reshape(1, HIDDEN_D)
    cls_tok = np.asarray(jax.random.uniform(next(keys), (1, HIDDEN_D), jnp.float32))
    pos = get_positional_embeddings(SEQ, HIDDEN_D)

    qkv_w = np.zeros((N_BLOCKS, 3, N_HEADS, D_HEAD, D_HEAD), np.float32)
    qkv_b = np.zeros((N_BLOCKS, 3, N_HEADS, 1, D_HEAD), np.float32)
    ln_w = np.ones((N_BLOCKS, 2, 1, HIDDEN_D), np.float32)       # LayerNorm init
    ln_b = np.zeros((N_BLOCKS, 2, 1, HIDDEN_D), np.float32)
    w1 = np.zeros((N_BLOCKS, MLP_D, HIDDEN_D), np.float32)
    b1 = np.zeros((N_BLOCKS, 1, MLP_D), np.float32)
    w2 = np.zeros((N_BLOCKS, HIDDEN_D, MLP_D), np.float32)
    b2 = np.zeros((N_BLOCKS, 1, HIDDEN_D), np.float32)

    for blk in range(N_BLOCKS):
        for i in range(3):                      # 0:q  1:k  2:v
            for hh in range(N_HEADS):
                w_, b_ = init_linear(next(keys), D_HEAD, D_HEAD)
                qkv_w[blk, i, hh] = w_
                qkv_b[blk, i, hh, 0] = b_
        w_, b_ = init_linear(next(keys), MLP_D, HIDDEN_D)
        w1[blk], b1[blk, 0] = w_, b_
        w_, b_ = init_linear(next(keys), HIDDEN_D, MLP_D)
        w2[blk], b2[blk, 0] = w_, b_

    to_j = lambda a: jnp.asarray(a, jnp.float32)
    return tuple(map(to_j, (lm_w_, lm_b_, cls_tok, pos, ln_w, ln_b,
                            qkv_w, qkv_b, w1, b1, w2, b2)))

# TODO(synk): the classification head (out[:, 0] -> Linear -> Sigmoid) after the
# early `return out` in the PyTorch forward is unreachable dead code and is
# intentionally not implemented.


# ---------------------------------- main --------------------------------------
if __name__ == "__main__":
    key = jax.random.PRNGKey(0)
    k_img, k_par = jax.random.split(key)
    images = jax.random.normal(k_img, (N, C, H, W), jnp.float32)   # NCHW
    params = init_params(k_par)
    kparams = prepare_kernel_params(params)

    out = vit_forward(images, kparams)
    out = jax.block_until_ready(out)

    ref = jax.block_until_ready(vit_reference(images, params))
    # Tolerance budget: bf16 MXU operands (f32 accumulation), tanh-approximate
    # GELU vs. the exact-erf reference, and the EUP approximate reciprocal in
    # the softmax normalisation.
    np.testing.assert_allclose(np.asarray(out), np.asarray(ref),
                               rtol=3e-2, atol=3e-2)

    assert out.shape == (N, SEQ, HIDDEN_D)
    print("KERNEL_OK")
</pallas_src>

<mosaic_0001>
module attributes {stable_mosaic.version = 11 : i64} {
  func.func @vit_kernel(%arg0: i32, %arg1: memref<48x128xbf16, #tpu.memory_space<vmem>>, %arg2: memref<128x32xbf16, #tpu.memory_space<vmem>>, %arg3: memref<48x32xf32, #tpu.memory_space<vmem>>, %arg4: memref<48x48xf32, #tpu.memory_space<vmem>>, %arg5: memref<2x32x96xbf16, #tpu.memory_space<vmem>>, %arg6: memref<2x1x96xf32, #tpu.memory_space<vmem>>, %arg7: memref<2x32x128xbf16, #tpu.memory_space<vmem>>, %arg8: memref<2x1x128xf32, #tpu.memory_space<vmem>>, %arg9: memref<2x128x32xbf16, #tpu.memory_space<vmem>>, %arg10: memref<2x1x32xf32, #tpu.memory_space<vmem>>, %arg11: memref<48x32xf32, #tpu.memory_space<vmem>>) attributes {dimension_semantics = [#tpu.dimension_semantics<arbitrary>], iteration_bounds = array<i64: 1>, scalar_prefetch = 0 : i64, scratch_operands = 0 : i64, tpu.core_type = #tpu.core_type<tc>, window_params = [{pipeline_mode = #tpu.pipeline_mode<synchronous>, transform_indices = @transform_0, window_bounds = array<i64: 48, 128>}, {pipeline_mode = #tpu.pipeline_mode<synchronous>, transform_indices = @transform_1, window_bounds = array<i64: 128, 32>}, {pipeline_mode = #tpu.pipeline_mode<synchronous>, transform_indices = @transform_2, window_bounds = array<i64: 48, 32>}, {pipeline_mode = #tpu.pipeline_mode<synchronous>, transform_indices = @transform_3, window_bounds = array<i64: 48, 48>}, {pipeline_mode = #tpu.pipeline_mode<synchronous>, transform_indices = @transform_4, window_bounds = array<i64: 2, 32, 96>}, {pipeline_mode = #tpu.pipeline_mode<synchronous>, transform_indices = @transform_5, window_bounds = array<i64: 2, 1, 96>}, {pipeline_mode = #tpu.pipeline_mode<synchronous>, transform_indices = @transform_6, window_bounds = array<i64: 2, 32, 128>}, {pipeline_mode = #tpu.pipeline_mode<synchronous>, transform_indices = @transform_7, window_bounds = array<i64: 2, 1, 128>}, {pipeline_mode = #tpu.pipeline_mode<synchronous>, transform_indices = @transform_8, window_bounds = array<i64: 2, 128, 32>}, {pipeline_mode = #tpu.pipeline_mode<synchronous>, transform_indices = @transform_9, window_bounds = array<i64: 2, 1, 32>}, {pipeline_mode = #tpu.pipeline_mode<synchronous>, transform_indices = @transform_10, window_bounds = array<i64: 48, 32>}]} {
    %c0 = arith.constant 0 : index
    %c0_0 = arith.constant 0 : index
    %0 = vector.load %arg1[%c0, %c0_0] : memref<48x128xbf16, #tpu.memory_space<vmem>>, vector<48x128xbf16>
    %c0_1 = arith.constant 0 : index
    %c0_2 = arith.constant 0 : index
    %1 = vector.load %arg2[%c0_1, %c0_2] : memref<128x32xbf16, #tpu.memory_space<vmem>>, vector<128x32xbf16>
    %cst = arith.constant dense<0.000000e+00> : vector<48x32xf32>
    %2 = tpu.matmul %0, %1, %cst {dimension_numbers = #tpu.dot_dimension_numbers<[1], [0], [0], [1], [0, 0, 1, 1], [], []>} : vector<48x128xbf16>, vector<128x32xbf16>, vector<48x32xf32> -> vector<48x32xf32>
    %c0_3 = arith.constant 0 : index
    %c0_4 = arith.constant 0 : index
    %3 = vector.load %arg3[%c0_3, %c0_4] : memref<48x32xf32, #tpu.memory_space<vmem>>, vector<48x32xf32>
    %4 = arith.addf %2, %3 : vector<48x32xf32>
    %c0_5 = arith.constant 0 : index
    %c0_6 = arith.constant 0 : index
    %5 = vector.load %arg4[%c0_5, %c0_6] : memref<48x48xf32, #tpu.memory_space<vmem>>, vector<48x48xf32>
    %cst_7 = arith.constant dense<0.000000e+00> : vector<48xf32>
    %6 = vector.multi_reduction <add>, %4, %cst_7 [1] : vector<48x32xf32> to vector<48xf32>
    %7 = vector.shape_cast %6 : vector<48xf32> to vector<48x1xf32>
    %cst_8 = arith.constant 3.200000e+01 : f32
    %8 = vector.broadcast %cst_8 : f32 to vector<48x1xf32>
    %9 = arith.divf %7, %8 : vector<48x1xf32>
    %10 = vector.broadcast %9 : vector<48x1xf32> to vector<48x32xf32>
    %11 = arith.subf %4, %10 : vector<48x32xf32>
    %12 = arith.mulf %11, %11 : vector<48x32xf32>
    %cst_9 = arith.constant dense<0.000000e+00> : vector<48xf32>
    %13 = vector.multi_reduction <add>, %12, %cst_9 [1] : vector<48x32xf32> to vector<48xf32>
    %14 = vector.shape_cast %13 : vector<48xf32> to vector<48x1xf32>
    %cst_10 = arith.constant 3.200000e+01 : f32
    %15 = vector.broadcast %cst_10 : f32 to vector<48x1xf32>
    %16 = arith.divf %14, %15 : vector<48x1xf32>
    %17 = vector.broadcast %9 : vector<48x1xf32> to vector<48x32xf32>
    %18 = arith.subf %4, %17 : vector<48x32xf32>
    %cst_11 = arith.constant 9.99999974E-6 : f32
    %19 = vector.broadcast %cst_11 : f32 to vector<48x1xf32>
    %20 = arith.addf %16, %19 : vector<48x1xf32>
    %21 = math.rsqrt %20 : vector<48x1xf32>
    %22 = vector.broadcast %21 : vector<48x1xf32> to vector<48x32xf32>
    %23 = arith.mulf %18, %22 : vector<48x32xf32>
    %24 = arith.truncf %23 : vector<48x32xf32> to vector<48x32xbf16>
    %c0_12 = arith.constant 0 : index
    %c0_13 = arith.constant 0 : index
    %c0_14 = arith.constant 0 : index
    %25 = vector.load %arg5[%c0_12, %c0_13, %c0_14] : memref<2x32x96xbf16, #tpu.memory_space<vmem>>, vector<1x32x96xbf16>
    %26 = vector.shape_cast %25 : vector<1x32x96xbf16> to vector<32x96xbf16>
    %cst_15 = arith.constant dense<0.000000e+00> : vector<48x96xf32>
    %27 = tpu.matmul %24, %26, %cst_15 {dimension_numbers = #tpu.dot_dimension_numbers<[1], [0], [0], [1], [0, 0, 1, 1], [], []>} : vector<48x32xbf16>, vector<32x96xbf16>, vector<48x96xf32> -> vector<48x96xf32>
    %c0_16 = arith.constant 0 : index
    %c0_17 = arith.constant 0 : index
    %c0_18 = arith.constant 0 : index
    %28 = vector.load %arg6[%c0_16, %c0_17, %c0_18] : memref<2x1x96xf32, #tpu.memory_space<vmem>>, vector<1x1x96xf32>
    %29 = vector.shape_cast %28 : vector<1x1x96xf32> to vector<1x96xf32>
    %30 = vector.broadcast %29 : vector<1x96xf32> to vector<48x96xf32>
    %31 = arith.addf %27, %30 : vector<48x96xf32>
    %32 = vector.extract_strided_slice %31 {offsets = [0, 0], sizes = [48, 16], strides = [1, 1]} : vector<48x96xf32> to vector<48x16xf32>
    %33 = arith.truncf %32 : vector<48x16xf32> to vector<48x16xbf16>
    %34 = vector.extract_strided_slice %31 {offsets = [0, 32], sizes = [48, 16], strides = [1, 1]} : vector<48x96xf32> to vector<48x16xf32>
    %35 = arith.truncf %34 : vector<48x16xf32> to vector<48x16xbf16>
    %36 = vector.extract_strided_slice %31 {offsets = [0, 64], sizes = [48, 16], strides = [1, 1]} : vector<48x96xf32> to vector<48x16xf32>
    %37 = arith.truncf %36 : vector<48x16xf32> to vector<48x16xbf16>
    %cst_19 = arith.constant dense<0.000000e+00> : vector<48x48xf32>
    %38 = tpu.matmul %33, %35, %cst_19 {dimension_numbers = #tpu.dot_dimension_numbers<[1], [1], [0], [0], [0, 0, 1, 0], [], []>} : vector<48x16xbf16>, vector<48x16xbf16>, vector<48x48xf32> -> vector<48x48xf32>
    %39 = arith.addf %38, %5 : vector<48x48xf32>
    %cst_20 = arith.constant dense<0xFF800000> : vector<48xf32>
    %40 = vector.multi_reduction <maximumf>, %39, %cst_20 [1] : vector<48x48xf32> to vector<48xf32>
    %41 = vector.shape_cast %40 : vector<48xf32> to vector<48x1xf32>
    %42 = vector.broadcast %41 : vector<48x1xf32> to vector<48x48xf32>
    %43 = arith.subf %39, %42 : vector<48x48xf32>
    %44 = math.exp %43 : vector<48x48xf32>
    %cst_21 = arith.constant dense<0.000000e+00> : vector<48xf32>
    %45 = vector.multi_reduction <add>, %44, %cst_21 [1] : vector<48x48xf32> to vector<48xf32>
    %46 = vector.shape_cast %45 : vector<48xf32> to vector<48x1xf32>
    %47 = tpu.reciprocal %46 {approx = true} : vector<48x1xf32> -> vector<48x1xf32>
    %48 = vector.broadcast %47 : vector<48x1xf32> to vector<48x48xf32>
    %49 = arith.mulf %44, %48 : vector<48x48xf32>
    %50 = arith.truncf %49 : vector<48x48xf32> to vector<48x48xbf16>
    %cst_22 = arith.constant dense<0.000000e+00> : vector<48x16xf32>
    %51 = tpu.matmul %50, %37, %cst_22 {dimension_numbers = #tpu.dot_dimension_numbers<[1], [0], [0], [1], [0, 0, 1, 1], [], []>} : vector<48x48xbf16>, vector<48x16xbf16>, vector<48x16xf32> -> vector<48x16xf32>
    %52 = vector.extract_strided_slice %31 {offsets = [0, 16], sizes = [48, 16], strides = [1, 1]} : vector<48x96xf32> to vector<48x16xf32>
    %53 = arith.truncf %52 : vector<48x16xf32> to vector<48x16xbf16>
    %54 = vector.extract_strided_slice %31 {offsets = [0, 48], sizes = [48, 16], strides = [1, 1]} : vector<48x96xf32> to vector<48x16xf32>
    %55 = arith.truncf %54 : vector<48x16xf32> to vector<48x16xbf16>
    %56 = vector.extract_strided_slice %31 {offsets = [0, 80], sizes = [48, 16], strides = [1, 1]} : vector<48x96xf32> to vector<48x16xf32>
    %57 = arith.truncf %56 : vector<48x16xf32> to vector<48x16xbf16>
    %cst_23 = arith.constant dense<0.000000e+00> : vector<48x48xf32>
    %58 = tpu.matmul %53, %55, %cst_23 {dimension_numbers = #tpu.dot_dimension_numbers<[1], [1], [0], [0], [0, 0, 1, 0], [], []>} : vector<48x16xbf16>, vector<48x16xbf16>, vector<48x48xf32> -> vector<48x48xf32>
    %59 = arith.addf %58, %5 : vector<48x48xf32>
    %cst_24 = arith.constant dense<0xFF800000> : vector<48xf32>
    %60 = vector.multi_reduction <maximumf>, %59, %cst_24 [1] : vector<48x48xf32> to vector<48xf32>
    %61 = vector.shape_cast %60 : vector<48xf32> to vector<48x1xf32>
    %62 = vector.broadcast %61 : vector<48x1xf32> to vector<48x48xf32>
    %63 = arith.subf %59, %62 : vector<48x48xf32>
    %64 = math.exp %63 : vector<48x48xf32>
    %cst_25 = arith.constant dense<0.000000e+00> : vector<48xf32>
    %65 = vector.multi_reduction <add>, %64, %cst_25 [1] : vector<48x48xf32> to vector<48xf32>
    %66 = vector.shape_cast %65 : vector<48xf32> to vector<48x1xf32>
    %67 = tpu.reciprocal %66 {approx = true} : vector<48x1xf32> -> vector<48x1xf32>
    %68 = vector.broadcast %67 : vector<48x1xf32> to vector<48x48xf32>
    %69 = arith.mulf %64, %68 : vector<48x48xf32>
    %70 = arith.truncf %69 : vector<48x48xf32> to vector<48x48xbf16>
    %cst_26 = arith.constant dense<0.000000e+00> : vector<48x16xf32>
    %71 = tpu.matmul %70, %57, %cst_26 {dimension_numbers = #tpu.dot_dimension_numbers<[1], [0], [0], [1], [0, 0, 1, 1], [], []>} : vector<48x48xbf16>, vector<48x16xbf16>, vector<48x16xf32> -> vector<48x16xf32>
    %72 = tpu.concatenate %51, %71 in 1 : vector<48x16xf32>, vector<48x16xf32> -> vector<48x32xf32>
    %73 = arith.addf %4, %72 : vector<48x32xf32>
    %cst_27 = arith.constant dense<0.000000e+00> : vector<48xf32>
    %74 = vector.multi_reduction <add>, %73, %cst_27 [1] : vector<48x32xf32> to vector<48xf32>
    %75 = vector.shape_cast %74 : vector<48xf32> to vector<48x1xf32>
    %cst_28 = arith.constant 3.200000e+01 : f32
    %76 = vector.broadcast %cst_28 : f32 to vector<48x1xf32>
    %77 = arith.divf %75, %76 : vector<48x1xf32>
    %78 = vector.broadcast %77 : vector<48x1xf32> to vector<48x32xf32>
    %79 = arith.subf %73, %78 : vector<48x32xf32>
    %80 = arith.mulf %79, %79 : vector<48x32xf32>
    %cst_29 = arith.constant dense<0.000000e+00> : vector<48xf32>
    %81 = vector.multi_reduction <add>, %80, %cst_29 [1] : vector<48x32xf32> to vector<48xf32>
    %82 = vector.shape_cast %81 : vector<48xf32> to vector<48x1xf32>
    %cst_30 = arith.constant 3.200000e+01 : f32
    %83 = vector.broadcast %cst_30 : f32 to vector<48x1xf32>
    %84 = arith.divf %82, %83 : vector<48x1xf32>
    %85 = vector.broadcast %77 : vector<48x1xf32> to vector<48x32xf32>
    %86 = arith.subf %73, %85 : vector<48x32xf32>
    %cst_31 = arith.constant 9.99999974E-6 : f32
    %87 = vector.broadcast %cst_31 : f32 to vector<48x1xf32>
    %88 = arith.addf %84, %87 : vector<48x1xf32>
    %89 = math.rsqrt %88 : vector<48x1xf32>
    %90 = vector.broadcast %89 : vector<48x1xf32> to vector<48x32xf32>
    %91 = arith.mulf %86, %90 : vector<48x32xf32>
    %92 = arith.truncf %91 : vector<48x32xf32> to vector<48x32xbf16>
    %c0_32 = arith.constant 0 : index
    %c0_33 = arith.constant 0 : index
    %c0_34 = arith.constant 0 : index
    %93 = vector.load %arg7[%c0_32, %c0_33, %c0_34] : memref<2x32x128xbf16, #tpu.memory_space<vmem>>, vector<1x32x128xbf16>
    %94 = vector.shape_cast %93 : vector<1x32x128xbf16> to vector<32x128xbf16>
    %cst_35 = arith.constant dense<0.000000e+00> : vector<48x128xf32>
    %95 = tpu.matmul %92, %94, %cst_35 {dimension_numbers = #tpu.dot_dimension_numbers<[1], [0], [0], [1], [0, 0, 1, 1], [], []>} : vector<48x32xbf16>, vector<32x128xbf16>, vector<48x128xf32> -> vector<48x128xf32>
    %c0_36 = arith.constant 0 : index
    %c0_37 = arith.constant 0 : index
    %c0_38 = arith.constant 0 : index
    %96 = vector.load %arg8[%c0_36, %c0_37, %c0_38] : memref<2x1x128xf32, #tpu.memory_space<vmem>>, vector<1x1x128xf32>
    %97 = vector.shape_cast %96 : vector<1x1x128xf32> to vector<1x128xf32>
    %98 = vector.broadcast %97 : vector<1x128xf32> to vector<48x128xf32>
    %99 = arith.addf %95, %98 : vector<48x128xf32>
    %100 = arith.mulf %99, %99 : vector<48x128xf32>
    %101 = arith.mulf %99, %100 : vector<48x128xf32>
    %cst_39 = arith.constant 4.471500e-02 : f32
    %102 = vector.broadcast %cst_39 : f32 to vector<48x128xf32>
    %103 = arith.mulf %102, %101 : vector<48x128xf32>
    %104 = arith.addf %99, %103 : vector<48x128xf32>
    %cst_40 = arith.constant 0.797884583 : f32
    %105 = vector.broadcast %cst_40 : f32 to vector<48x128xf32>
    %106 = arith.mulf %105, %104 : vector<48x128xf32>
    %107 = math.tanh %106 : vector<48x128xf32>
    %cst_41 = arith.constant 1.000000e+00 : f32
    %108 = vector.broadcast %cst_41 : f32 to vector<48x128xf32>
    %109 = arith.addf %108, %107 : vector<48x128xf32>
    %cst_42 = arith.constant 5.000000e-01 : f32
    %110 = vector.broadcast %cst_42 : f32 to vector<48x128xf32>
    %111 = arith.mulf %110, %109 : vector<48x128xf32>
    %112 = arith.mulf %99, %111 : vector<48x128xf32>
    %113 = arith.truncf %112 : vector<48x128xf32> to vector<48x128xbf16>
    %c0_43 = arith.constant 0 : index
    %c0_44 = arith.constant 0 : index
    %c0_45 = arith.constant 0 : index
    %114 = vector.load %arg9[%c0_43, %c0_44, %c0_45] : memref<2x128x32xbf16, #tpu.memory_space<vmem>>, vector<1x128x32xbf16>
    %115 = vector.shape_cast %114 : vector<1x128x32xbf16> to vector<128x32xbf16>
    %cst_46 = arith.constant dense<0.000000e+00> : vector<48x32xf32>
    %116 = tpu.matmul %113, %115, %cst_46 {dimension_numbers = #tpu.dot_dimension_numbers<[1], [0], [0], [1], [0, 0, 1, 1], [], []>} : vector<48x128xbf16>, vector<128x32xbf16>, vector<48x32xf32> -> vector<48x32xf32>
    %117 = arith.addf %73, %116 : vector<48x32xf32>
    %c0_47 = arith.constant 0 : index
    %c0_48 = arith.constant 0 : index
    %c0_49 = arith.constant 0 : index
    %118 = vector.load %arg10[%c0_47, %c0_48, %c0_49] : memref<2x1x32xf32, #tpu.memory_space<vmem>>, vector<1x1x32xf32>
    %119 = vector.shape_cast %118 : vector<1x1x32xf32> to vector<1x32xf32>
    %120 = vector.broadcast %119 : vector<1x32xf32> to vector<48x32xf32>
    %121 = arith.addf %117, %120 : vector<48x32xf32>
    %cst_50 = arith.constant dense<0.000000e+00> : vector<48xf32>
    %122 = vector.multi_reduction <add>, %121, %cst_50 [1] : vector<48x32xf32> to vector<48xf32>
    %123 = vector.shape_cast %122 : vector<48xf32> to vector<48x1xf32>
    %cst_51 = arith.constant 3.200000e+01 : f32
    %124 = vector.broadcast %cst_51 : f32 to vector<48x1xf32>
    %125 = arith.divf %123, %124 : vector<48x1xf32>
    %126 = vector.broadcast %125 : vector<48x1xf32> to vector<48x32xf32>
    %127 = arith.subf %121, %126 : vector<48x32xf32>
    %128 = arith.mulf %127, %127 : vector<48x32xf32>
    %cst_52 = arith.constant dense<0.000000e+00> : vector<48xf32>
    %129 = vector.multi_reduction <add>, %128, %cst_52 [1] : vector<48x32xf32> to vector<48xf32>
    %130 = vector.shape_cast %129 : vector<48xf32> to vector<48x1xf32>
    %cst_53 = arith.constant 3.200000e+01 : f32
    %131 = vector.broadcast %cst_53 : f32 to vector<48x1xf32>
    %132 = arith.divf %130, %131 : vector<48x1xf32>
    %133 = vector.broadcast %125 : vector<48x1xf32> to vector<48x32xf32>
    %134 = arith.subf %121, %133 : vector<48x32xf32>
    %cst_54 = arith.constant 9.99999974E-6 : f32
    %135 = vector.broadcast %cst_54 : f32 to vector<48x1xf32>
    %136 = arith.addf %132, %135 : vector<48x1xf32>
    %137 = math.rsqrt %136 : vector<48x1xf32>
    %138 = vector.broadcast %137 : vector<48x1xf32> to vector<48x32xf32>
    %139 = arith.mulf %134, %138 : vector<48x32xf32>
    %140 = arith.truncf %139 : vector<48x32xf32> to vector<48x32xbf16>
    %c1 = arith.constant 1 : index
    %c0_55 = arith.constant 0 : index
    %c0_56 = arith.constant 0 : index
    %141 = vector.load %arg5[%c1, %c0_55, %c0_56] : memref<2x32x96xbf16, #tpu.memory_space<vmem>>, vector<1x32x96xbf16>
    %142 = vector.shape_cast %141 : vector<1x32x96xbf16> to vector<32x96xbf16>
    %cst_57 = arith.constant dense<0.000000e+00> : vector<48x96xf32>
    %143 = tpu.matmul %140, %142, %cst_57 {dimension_numbers = #tpu.dot_dimension_numbers<[1], [0], [0], [1], [0, 0, 1, 1], [], []>} : vector<48x32xbf16>, vector<32x96xbf16>, vector<48x96xf32> -> vector<48x96xf32>
    %c1_58 = arith.constant 1 : index
    %c0_59 = arith.constant 0 : index
    %c0_60 = arith.constant 0 : index
    %144 = vector.load %arg6[%c1_58, %c0_59, %c0_60] : memref<2x1x96xf32, #tpu.memory_space<vmem>>, vector<1x1x96xf32>
    %145 = vector.shape_cast %144 : vector<1x1x96xf32> to vector<1x96xf32>
    %146 = vector.broadcast %145 : vector<1x96xf32> to vector<48x96xf32>
    %147 = arith.addf %143, %146 : vector<48x96xf32>
    %148 = vector.extract_strided_slice %147 {offsets = [0, 0], sizes = [48, 16], strides = [1, 1]} : vector<48x96xf32> to vector<48x16xf32>
    %149 = arith.truncf %148 : vector<48x16xf32> to vector<48x16xbf16>
    %150 = vector.extract_strided_slice %147 {offsets = [0, 32], sizes = [48, 16], strides = [1, 1]} : vector<48x96xf32> to vector<48x16xf32>
    %151 = arith.truncf %150 : vector<48x16xf32> to vector<48x16xbf16>
    %152 = vector.extract_strided_slice %147 {offsets = [0, 64], sizes = [48, 16], strides = [1, 1]} : vector<48x96xf32> to vector<48x16xf32>
    %153 = arith.truncf %152 : vector<48x16xf32> to vector<48x16xbf16>
    %cst_61 = arith.constant dense<0.000000e+00> : vector<48x48xf32>
    %154 = tpu.matmul %149, %151, %cst_61 {dimension_numbers = #tpu.dot_dimension_numbers<[1], [1], [0], [0], [0, 0, 1, 0], [], []>} : vector<48x16xbf16>, vector<48x16xbf16>, vector<48x48xf32> -> vector<48x48xf32>
    %155 = arith.addf %154, %5 : vector<48x48xf32>
    %cst_62 = arith.constant dense<0xFF800000> : vector<48xf32>
    %156 = vector.multi_reduction <maximumf>, %155, %cst_62 [1] : vector<48x48xf32> to vector<48xf32>
    %157 = vector.shape_cast %156 : vector<48xf32> to vector<48x1xf32>
    %158 = vector.broadcast %157 : vector<48x1xf32> to vector<48x48xf32>
    %159 = arith.subf %155, %158 : vector<48x48xf32>
    %160 = math.exp %159 : vector<48x48xf32>
    %cst_63 = arith.constant dense<0.000000e+00> : vector<48xf32>
    %161 = vector.multi_reduction <add>, %160, %cst_63 [1] : vector<48x48xf32> to vector<48xf32>
    %162 = vector.shape_cast %161 : vector<48xf32> to vector<48x1xf32>
    %163 = tpu.reciprocal %162 {approx = true} : vector<48x1xf32> -> vector<48x1xf32>
    %164 = vector.broadcast %163 : vector<48x1xf32> to vector<48x48xf32>
    %165 = arith.mulf %160, %164 : vector<48x48xf32>
    %166 = arith.truncf %165 : vector<48x48xf32> to vector<48x48xbf16>
    %cst_64 = arith.constant dense<0.000000e+00> : vector<48x16xf32>
    %167 = tpu.matmul %166, %153, %cst_64 {dimension_numbers = #tpu.dot_dimension_numbers<[1], [0], [0], [1], [0, 0, 1, 1], [], []>} : vector<48x48xbf16>, vector<48x16xbf16>, vector<48x16xf32> -> vector<48x16xf32>
    %168 = vector.extract_strided_slice %147 {offsets = [0, 16], sizes = [48, 16], strides = [1, 1]} : vector<48x96xf32> to vector<48x16xf32>
    %169 = arith.truncf %168 : vector<48x16xf32> to vector<48x16xbf16>
    %170 = vector.extract_strided_slice %147 {offsets = [0, 48], sizes = [48, 16], strides = [1, 1]} : vector<48x96xf32> to vector<48x16xf32>
    %171 = arith.truncf %170 : vector<48x16xf32> to vector<48x16xbf16>
    %172 = vector.extract_strided_slice %147 {offsets = [0, 80], sizes = [48, 16], strides = [1, 1]} : vector<48x96xf32> to vector<48x16xf32>
    %173 = arith.truncf %172 : vector<48x16xf32> to vector<48x16xbf16>
    %cst_65 = arith.constant dense<0.000000e+00> : vector<48x48xf32>
    %174 = tpu.matmul %169, %171, %cst_65 {dimension_numbers = #tpu.dot_dimension_numbers<[1], [1], [0], [0], [0, 0, 1, 0], [], []>} : vector<48x16xbf16>, vector<48x16xbf16>, vector<48x48xf32> -> vector<48x48xf32>
    %175 = arith.addf %174, %5 : vector<48x48xf32>
    %cst_66 = arith.constant dense<0xFF800000> : vector<48xf32>
    %176 = vector.multi_reduction <maximumf>, %175, %cst_66 [1] : vector<48x48xf32> to vector<48xf32>
    %177 = vector.shape_cast %176 : vector<48xf32> to vector<48x1xf32>
    %178 = vector.broadcast %177 : vector<48x1xf32> to vector<48x48xf32>
    %179 = arith.subf %175, %178 : vector<48x48xf32>
    %180 = math.exp %179 : vector<48x48xf32>
    %cst_67 = arith.constant dense<0.000000e+00> : vector<48xf32>
    %181 = vector.multi_reduction <add>, %180, %cst_67 [1] : vector<48x48xf32> to vector<48xf32>
    %182 = vector.shape_cast %181 : vector<48xf32> to vector<48x1xf32>
    %183 = tpu.reciprocal %182 {approx = true} : vector<48x1xf32> -> vector<48x1xf32>
    %184 = vector.broadcast %183 : vector<48x1xf32> to vector<48x48xf32>
    %185 = arith.mulf %180, %184 : vector<48x48xf32>
    %186 = arith.truncf %185 : vector<48x48xf32> to vector<48x48xbf16>
    %cst_68 = arith.constant dense<0.000000e+00> : vector<48x16xf32>
    %187 = tpu.matmul %186, %173, %cst_68 {dimension_numbers = #tpu.dot_dimension_numbers<[1], [0], [0], [1], [0, 0, 1, 1], [], []>} : vector<48x48xbf16>, vector<48x16xbf16>, vector<48x16xf32> -> vector<48x16xf32>
    %188 = tpu.concatenate %167, %187 in 1 : vector<48x16xf32>, vector<48x16xf32> -> vector<48x32xf32>
    %189 = arith.addf %121, %188 : vector<48x32xf32>
    %cst_69 = arith.constant dense<0.000000e+00> : vector<48xf32>
    %190 = vector.multi_reduction <add>, %189, %cst_69 [1] : vector<48x32xf32> to vector<48xf32>
    %191 = vector.shape_cast %190 : vector<48xf32> to vector<48x1xf32>
    %cst_70 = arith.constant 3.200000e+01 : f32
    %192 = vector.broadcast %cst_70 : f32 to vector<48x1xf32>
    %193 = arith.divf %191, %192 : vector<48x1xf32>
    %194 = vector.broadcast %193 : vector<48x1xf32> to vector<48x32xf32>
    %195 = arith.subf %189, %194 : vector<48x32xf32>
    %196 = arith.mulf %195, %195 : vector<48x32xf32>
    %cst_71 = arith.constant dense<0.000000e+00> : vector<48xf32>
    %197 = vector.multi_reduction <add>, %196, %cst_71 [1] : vector<48x32xf32> to vector<48xf32>
    %198 = vector.shape_cast %197 : vector<48xf32> to vector<48x1xf32>
    %cst_72 = arith.constant 3.200000e+01 : f32
    %199 = vector.broadcast %cst_72 : f32 to vector<48x1xf32>
    %200 = arith.divf %198, %199 : vector<48x1xf32>
    %201 = vector.broadcast %193 : vector<48x1xf32> to vector<48x32xf32>
    %202 = arith.subf %189, %201 : vector<48x32xf32>
    %cst_73 = arith.constant 9.99999974E-6 : f32
    %203 = vector.broadcast %cst_73 : f32 to vector<48x1xf32>
    %204 = arith.addf %200, %203 : vector<48x1xf32>
    %205 = math.rsqrt %204 : vector<48x1xf32>
    %206 = vector.broadcast %205 : vector<48x1xf32> to vector<48x32xf32>
    %207 = arith.mulf %202, %206 : vector<48x32xf32>
    %208 = arith.truncf %207 : vector<48x32xf32> to vector<48x32xbf16>
    %c1_74 = arith.constant 1 : index
    %c0_75 = arith.constant 0 : index
    %c0_76 = arith.constant 0 : index
    %209 = vector.load %arg7[%c1_74, %c0_75, %c0_76] : memref<2x32x128xbf16, #tpu.memory_space<vmem>>, vector<1x32x128xbf16>
    %210 = vector.shape_cast %209 : vector<1x32x128xbf16> to vector<32x128xbf16>
    %cst_77 = arith.constant dense<0.000000e+00> : vector<48x128xf32>
    %211 = tpu.matmul %208, %210, %cst_77 {dimension_numbers = #tpu.dot_dimension_numbers<[1], [0], [0], [1], [0, 0, 1, 1], [], []>} : vector<48x32xbf16>, vector<32x128xbf16>, vector<48x128xf32> -> vector<48x128xf32>
    %c1_78 = arith.constant 1 : index
    %c0_79 = arith.constant 0 : index
    %c0_80 = arith.constant 0 : index
    %212 = vector.load %arg8[%c1_78, %c0_79, %c0_80] : memref<2x1x128xf32, #tpu.memory_space<vmem>>, vector<1x1x128xf32>
    %213 = vector.shape_cast %212 : vector<1x1x128xf32> to vector<1x128xf32>
    %214 = vector.broadcast %213 : vector<1x128xf32> to vector<48x128xf32>
    %215 = arith.addf %211, %214 : vector<48x128xf32>
    %216 = arith.mulf %215, %215 : vector<48x128xf32>
    %217 = arith.mulf %215, %216 : vector<48x128xf32>
    %cst_81 = arith.constant 4.471500e-02 : f32
    %218 = vector.broadcast %cst_81 : f32 to vector<48x128xf32>
    %219 = arith.mulf %218, %217 : vector<48x128xf32>
    %220 = arith.addf %215, %219 : vector<48x128xf32>
    %cst_82 = arith.constant 0.797884583 : f32
    %221 = vector.broadcast %cst_82 : f32 to vector<48x128xf32>
    %222 = arith.mulf %221, %220 : vector<48x128xf32>
    %223 = math.tanh %222 : vector<48x128xf32>
    %cst_83 = arith.constant 1.000000e+00 : f32
    %224 = vector.broadcast %cst_83 : f32 to vector<48x128xf32>
    %225 = arith.addf %224, %223 : vector<48x128xf32>
    %cst_84 = arith.constant 5.000000e-01 : f32
    %226 = vector.broadcast %cst_84 : f32 to vector<48x128xf32>
    %227 = arith.mulf %226, %225 : vector<48x128xf32>
    %228 = arith.mulf %215, %227 : vector<48x128xf32>
    %229 = arith.truncf %228 : vector<48x128xf32> to vector<48x128xbf16>
    %c1_85 = arith.constant 1 : index
    %c0_86 = arith.constant 0 : index
    %c0_87 = arith.constant 0 : index
    %230 = vector.load %arg9[%c1_85, %c0_86, %c0_87] : memref<2x128x32xbf16, #tpu.memory_space<vmem>>, vector<1x128x32xbf16>
    %231 = vector.shape_cast %230 : vector<1x128x32xbf16> to vector<128x32xbf16>
    %cst_88 = arith.constant dense<0.000000e+00> : vector<48x32xf32>
    %232 = tpu.matmul %229, %231, %cst_88 {dimension_numbers = #tpu.dot_dimension_numbers<[1], [0], [0], [1], [0, 0, 1, 1], [], []>} : vector<48x128xbf16>, vector<128x32xbf16>, vector<48x32xf32> -> vector<48x32xf32>
    %233 = arith.addf %189, %232 : vector<48x32xf32>
    %c1_89 = arith.constant 1 : index
    %c0_90 = arith.constant 0 : index
    %c0_91 = arith.constant 0 : index
    %234 = vector.load %arg10[%c1_89, %c0_90, %c0_91] : memref<2x1x32xf32, #tpu.memory_space<vmem>>, vector<1x1x32xf32>
    %235 = vector.shape_cast %234 : vector<1x1x32xf32> to vector<1x32xf32>
    %236 = vector.broadcast %235 : vector<1x32xf32> to vector<48x32xf32>
    %237 = arith.addf %233, %236 : vector<48x32xf32>
    %c0_92 = arith.constant 0 : index
    %c0_93 = arith.constant 0 : index
    %238 = vector.load %arg11[%c0_92, %c0_93] : memref<48x32xf32, #tpu.memory_space<vmem>>, vector<48x32xf32>
    tpu.vector_store %arg11[%c0_92, %c0_93], %237 {strides = array<i32>} : memref<48x32xf32, #tpu.memory_space<vmem>>, vector<48x32xf32>,
    return
  }
  func.func @transform_0(%arg0: i32) -> (i32, i32) {
    %c0_i32 = arith.constant 0 : i32
    %c0_i32_0 = arith.constant 0 : i32
    %c0_i32_1 = arith.constant 0 : i32
    return %c0_i32, %c0_i32_0 : i32, i32
  }
  func.func @transform_1(%arg0: i32) -> (i32, i32) {
    %c0_i32 = arith.constant 0 : i32
    %c0_i32_0 = arith.constant 0 : i32
    %c0_i32_1 = arith.constant 0 : i32
    return %c0_i32, %c0_i32_0 : i32, i32
  }
  func.func @transform_2(%arg0: i32) -> (i32, i32) {
    %c0_i32 = arith.constant 0 : i32
    %c0_i32_0 = arith.constant 0 : i32
    %c0_i32_1 = arith.constant 0 : i32
    return %c0_i32, %c0_i32_0 : i32, i32
  }
  func.func @transform_3(%arg0: i32) -> (i32, i32) {
    %c0_i32 = arith.constant 0 : i32
    %c0_i32_0 = arith.constant 0 : i32
    %c0_i32_1 = arith.constant 0 : i32
    return %c0_i32, %c0_i32_0 : i32, i32
  }
  func.func @transform_4(%arg0: i32) -> (i32, i32, i32) {
    %c0_i32 = arith.constant 0 : i32
    %c0_i32_0 = arith.constant 0 : i32
    %c0_i32_1 = arith.constant 0 : i32
    %c0_i32_2 = arith.constant 0 : i32
    return %c0_i32, %c0_i32_0, %c0_i32_1 : i32, i32, i32
  }
  func.func @transform_5(%arg0: i32) -> (i32, i32, i32) {
    %c0_i32 = arith.constant 0 : i32
    %c0_i32_0 = arith.constant 0 : i32
    %c0_i32_1 = arith.constant 0 : i32
    %c0_i32_2 = arith.constant 0 : i32
    return %c0_i32, %c0_i32_0, %c0_i32_1 : i32, i32, i32
  }
  func.func @transform_6(%arg0: i32) -> (i32, i32, i32) {
    %c0_i32 = arith.constant 0 : i32
    %c0_i32_0 = arith.constant 0 : i32
    %c0_i32_1 = arith.constant 0 : i32
    %c0_i32_2 = arith.constant 0 : i32
    return %c0_i32, %c0_i32_0, %c0_i32_1 : i32, i32, i32
  }
  func.func @transform_7(%arg0: i32) -> (i32, i32, i32) {
    %c0_i32 = arith.constant 0 : i32
    %c0_i32_0 = arith.constant 0 : i32
    %c0_i32_1 = arith.constant 0 : i32
    %c0_i32_2 = arith.constant 0 : i32
    return %c0_i32, %c0_i32_0, %c0_i32_1 : i32, i32, i32
  }
  func.func @transform_8(%arg0: i32) -> (i32, i32, i32) {
    %c0_i32 = arith.constant 0 : i32
    %c0_i32_0 = arith.constant 0 : i32
    %c0_i32_1 = arith.constant 0 : i32
    %c0_i32_2 = arith.constant 0 : i32
    return %c0_i32, %c0_i32_0, %c0_i32_1 : i32, i32, i32
  }
  func.func @transform_9(%arg0: i32) -> (i32, i32, i32) {
    %c0_i32 = arith.constant 0 : i32
    %c0_i32_0 = arith.constant 0 : i32
    %c0_i32_1 = arith.constant 0 : i32
    %c0_i32_2 = arith.constant 0 : i32
    return %c0_i32, %c0_i32_0, %c0_i32_1 : i32, i32, i32
  }
  func.func @transform_10(%arg0: i32) -> (i32, i32) {
    %c0_i32 = arith.constant 0 : i32
    %c0_i32_0 = arith.constant 0 : i32
    %c0_i32_1 = arith.constant 0 : i32
    return %c0_i32, %c0_i32_0 : i32, i32
  }
}

</mosaic_0001>

<bundles_post_ra>
// kernel: tpu_custom_call.1
= control target key start
LH: loop header
LB: loop body
LE: loop exit
PB: predicated region body
PF: predicated region fallthrough
CT: control target
= control target key end

     0   :  { %v2997_v0 = vmov 0.0   ;;  %vm2998_vm0 = vmmov 0   ;;  %vm193_vm1 = vcmask 261120   ;;  %s2999_s30 = smov 96   ;;  %s3000_s11 = smov 80   ;;  %vm377_vm2 = vcmask 130048   ;;  %s3917_s1 = inlined_call_operand.vmem [shape: bf16[128,32], index: 1, kind: input, shape index: {}]   ;;  %s3918_s0 = inlined_call_operand.vmem [shape: bf16[48,128], index: 0, kind: input, shape index: {}]   ;;  %s3919_s2 = inlined_call_operand.vmem [shape: f32[48,32], index: 2, kind: input, shape index: {}]   ;;  %s3920_s4 = inlined_call_operand.vmem [shape: bf16[2,32,96], index: 4, kind: input, shape index: {}]   ;;  %s3921_s5 = inlined_call_operand.vmem [shape: f32[2,1,96], index: 5, kind: input, shape index: {}]   ;;  %s3922_s3 = inlined_call_operand.vmem [shape: f32[48,48], index: 3, kind: input, shape index: {}]   ;;  %s3923_s6 = inlined_call_operand.vmem [shape: bf16[2,32,128], index: 6, kind: input, shape index: {}]   ;;  %s3924_s8 = inlined_call_operand.vmem [shape: bf16[2,128,32], index: 8, kind: input, shape index: {}]   ;;  %s3925_s7 = inlined_call_operand.vmem [shape: f32[2,1,128], index: 7, kind: input, shape index: {}]   ;;  %s3926_s9 = inlined_call_operand.vmem [shape: f32[2,1,32], index: 9, kind: input, shape index: {}]   ;;  %s3927_s10 = inlined_call_operand.vmem [shape: f32[48,32], index: 10, kind: output, shape index: {}]  }
   0x1   :  { %2488 = vmatprep.subr.bf16.mxu0 %v2997_v0  ;;  %v2788_v1 = vld [vmem:[%s3917_s1] sm:$0xff]   ;;  %2504 = vmatprep.mubr.msk.bf16.mxu0 %vm2998_vm0, %v2997_v0  ;;  %v2789_v2 = vld [vmem:[%s3917_s1 + $0x8] sm:$0xff]   ;;  %v2790_v3 = vld [vmem:[%s3917_s1 + $0x10] sm:$0xff]   ;;  %s3001_s12 = smov 112   ;;  %vm453_vm3 = vcmask 392192   ;;  %s3003_s24 = smov 48  }
   0x2   :  { %2516 = vmatprep.subr.bf16.mxu1 %v2997_v0  ;;  %2520 = vmatprep.mubr.msk.bf16.mxu1 %vm2998_vm0, %v2997_v0  ;;  %v2791_v4 = vld [vmem:[%s3917_s1 + $0x18] sm:$0xff]   ;;  %v2792_v5 = vld [vmem:[%s3917_s1 + $0x20] sm:$0xff]   ;;  %v2793_v6 = vld [vmem:[%s3917_s1 + $0x28] sm:$0xff]  }
   0x3   :  { %2489 = vmatpush3.bf16.msra.mxu0 %v2788_v1  ;;  %v2794_v7 = vld [vmem:[%s3917_s1 + $0x30] sm:$0xff]   ;;  %v2795_v8 = vld [vmem:[%s3917_s1 + $0x38] sm:$0xff]   ;;  %v2796_v9 = vld [vmem:[%s3918_s0] sm:$0xff]   ;;  %s3002_s1 = smov 64  }
   0x4   :  { %2490 = vmatprep.subr.bf16.mxu0 %v2997_v0  ;;  %v2797_v10 = vld [vmem:[%s3918_s0 + $0x8] sm:$0xff]   ;;  %v2798_v11 = vld [vmem:[%s3918_s0 + $0x10] sm:$0xff]   ;;  %v58_v12 = vld [vmem:[%s3919_s2] sm:$0xff] }
   0x5   :  { %v59_v14 = vld [vmem:[%s3919_s2 + $0x8] sm:$0xff]  ;;  %v60_v21 = vld [vmem:[%s3919_s2 + $0x10] sm:$0xff]  ;;  %v61_v24 = vld [vmem:[%s3919_s2 + $0x18] sm:$0xff] }
   0x6   :  { %v62_v31 = vld [vmem:[%s3919_s2 + $0x20] sm:$0xff]  ;;  %v63_v34 = vld [vmem:[%s3919_s2 + $0x28] sm:$0xff]  ;;  %s3004_s2 = smov 16  }
   0x7   :  { %2491 = vmatpush3.bf16.msra.mxu0 %v2789_v2 }
   0x8   :  { %2492 = vmatprep.subr.bf16.mxu0 %v2997_v0 }
   0xb   :  { %2493 = vmatpush3.bf16.msra.mxu0 %v2790_v3 }
   0xc   :  { %2494 = vmatprep.subr.bf16.mxu0 %v2997_v0 }
   0xf   :  { %2495 = vmatpush3.bf16.msra.mxu0 %v2791_v4 }
  0x10   :  { %2496 = vmatprep.subr.bf16.mxu0 %v2997_v0 }
  0x13   :  { %2497 = vmatpush3.bf16.msra.mxu0 %v2792_v5 }
  0x14   :  { %2498 = vmatprep.subr.bf16.mxu0 %v2997_v0 }
  0x17   :  { %2499 = vmatpush3.bf16.msra.mxu0 %v2793_v6 }
  0x18   :  { %2500 = vmatprep.subr.bf16.mxu0 %v2997_v0 }
  0x1b   :  { %2501 = vmatpush3.bf16.msra.mxu0 %v2794_v7 }
  0x1c   :  { %2502 = vmatprep.subr.bf16.mxu0 %v2997_v0 }
  0x1f   :  { %2503 = vmatpush3.bf16.msra.mxu0 %v2795_v8 }
  0x20   :  { %2550 = vmatprep.subr.bf16.mxu0 %v2997_v0 }
  0x22   :  { %2505 = vmatmul.mubr.bf16.vlgmr.msra.gmra.mrb[0].mxu0 %v2796_v9  ;;  %v2799_v9 = vld [vmem:[%s3920_s4] sm:$0xff]  }
  0x23   :  { %2508 = vmatprep.mubr.msk.bf16.mxu0 %vm2998_vm0, %v2997_v0  ;;  %2517 = vmatpush3.bf16.msra.mxu1 %v2799_v9 }
  0x24   :  { %2518 = vmatprep.subr.bf16.mxu1 %v2997_v0 }
  0x2a   :  { %2509 = vmatmul.mubr.bf16.gmra.mrb[4].mxu0 %v2797_v10  ;;  %v2800_v10 = vld [vmem:[%s3920_s4 + $0x8] sm:$0xff]  }
  0x2b   :  { %2512 = vmatprep.mubr.msk.bf16.mxu0 %vm2998_vm0, %v2997_v0  ;;  %2519 = vmatpush3.bf16.msra.mxu1 %v2800_v10 }
  0x2c   :  { %2532 = vmatprep.subr.bf16.mxu1 %v2997_v0 }
  0x32   :  { %2513 = vmatmul.mubr.bf16.gmra.mrb[8].mxu0 %v2798_v11 }
  0x33   :  { %2556 = vmatprep.mubr.msk.bf16.mxu0 %vm2998_vm0, %v2997_v0 }
  0xf5   :  { %v164_v13 = vpop.f32.mrb[0].mxu0 }
  0xf6   :  { %v3119_v15 = vadd.f32 %v164_v13, %v58_v12  ;;  %v2506_v16 = vpop.f32.mrb[1].mxu0 }
  0xf7   :  { %v167_v17 = vpop.f32.mrb[2].mxu0 }
  0xf8   :  { %v3121_v18 = vadd.f32 %v167_v17, %v59_v14  ;;  %v2507_v19 = vpop.f32.mrb[3].mxu0  ;;  %v194_v20 = vsel %vm193_vm1, %v3119_v15, 0.0 }
  0xf9   :  { %195 = vadd.xlane.f32.xlu0 %v194_v20 }
  0xfa   :  { %v197_v22 = vsel %vm193_vm1, %v3121_v18, 0.0 }
  0xfd   :  { %198 = vadd.xlane.f32.xlu0 %v197_v22  ;;  %v172_v23 = vpop.f32.mrb[4].mxu0 }
  0xfe   :  { %v3133_v25 = vadd.f32 %v172_v23, %v60_v21  ;;  %v2510_v26 = vpop.f32.mrb[5].mxu0 }
  0xff   :  { %v175_v27 = vpop.f32.mrb[6].mxu0 }
 0x100   :  { %v3135_v28 = vadd.f32 %v175_v27, %v61_v24  ;;  %v2511_v29 = vpop.f32.mrb[7].mxu0  ;;  %v200_v30 = vsel %vm193_vm1, %v3133_v25, 0.0 }
 0x101   :  { %201 = vadd.xlane.f32.xlu1 %v200_v30 }
 0x102   :  { %v203_v32 = vsel %vm193_vm1, %v3135_v28, 0.0 }
 0x105   :  { %204 = vadd.xlane.f32.xlu1 %v203_v32  ;;  %v180_v33 = vpop.f32.mrb[8].mxu0 }
 0x106   :  { %v3147_v35 = vadd.f32 %v180_v33, %v62_v31  ;;  %v2514_v36 = vpop.f32.mrb[9].mxu0 }
 0x107   :  { %v183_v37 = vpop.f32.mrb[10].mxu0 }
 0x108   :  { %v3149_v38 = vadd.f32 %v183_v37, %v63_v34  ;;  %v2515_v39 = vpop.f32.mrb[11].mxu0  ;;  %v206_v40 = vsel %vm193_vm1, %v3147_v35, 0.0 }
 0x109   :  { %207 = vadd.xlane.f32.xlu0 %v206_v40 }
 0x10a   :  { %v209_v41 = vsel %vm193_vm1, %v3149_v38, 0.0 }
 0x10b   :  { %210 = vadd.xlane.f32.xlu1 %v209_v41 }
 0x186   :  { %v196_v42 = vpop.xlane.xlu0 %195 }
 0x187   :  { %v213_v43 = vmul.f32 0.03125, %v196_v42 }
 0x189   :  { %v3156_v44 = vsub.f32 %v3119_v15, %v213_v43 }
 0x18a   :  { %v199_v45 = vpop.xlane.xlu0 %198 }
 0x18b   :  { %v214_v46 = vmul.f32 0.03125, %v199_v45  ;;  %v225_v47 = vmul.f32 %v3156_v44, %v3156_v44 }
 0x18d   :  { %v220_v48 = vsub.f32 %v3121_v18, %v214_v46  ;;  %v231_v49 = vsel %vm193_vm1, %v225_v47, 0.0 }
 0x18e   :  { %v202_v50 = vpop.xlane.xlu1 %201  ;;  %232 = vadd.xlane.f32.xlu0 %v231_v49 }
 0x18f   :  { %v215_v51 = vmul.f32 0.03125, %v202_v50  ;;  %v226_v52 = vmul.f32 %v220_v48, %v220_v48  ;;  %v2294_v50 = vld [vmem:[%s3921_s5] ss:$0 sm:$0xff] }
 0x191   :  { %v3163_v53 = vsub.f32 %v3133_v25, %v215_v51  ;;  %v234_v54 = vsel %vm193_vm1, %v226_v52, 0.0 }
 0x192   :  { %v205_v55 = vpop.xlane.xlu1 %204  ;;  %235 = vadd.xlane.f32.xlu1 %v234_v54 }
 0x193   :  { %v216_v56 = vmul.f32 0.03125, %v205_v55  ;;  %v227_v57 = vmul.f32 %v3163_v53, %v3163_v53 }
 0x195   :  { %v222_v58 = vsub.f32 %v3135_v28, %v216_v56  ;;  %v237_v59 = vsel %vm193_vm1, %v227_v57, 0.0 }
 0x196   :  { %238 = vadd.xlane.f32.xlu0 %v237_v59  ;;  %v208_v60 = vpop.xlane.xlu0 %207 }
 0x197   :  { %v217_v61 = vmul.f32 0.03125, %v208_v60  ;;  %v228_v62 = vmul.f32 %v222_v58, %v222_v58 }
 0x198   :  { %v211_v63 = vpop.xlane.xlu1 %210 }
 0x199   :  { %v223_v1 = vsub.f32 %v3147_v35, %v217_v61  ;;  %v218_v2 = vmul.f32 0.03125, %v211_v63  ;;  %v240_v3 = vsel %vm193_vm1, %v228_v62, 0.0 }
 0x19a   :  { %241 = vadd.xlane.f32.xlu1 %v240_v3 }
 0x19b   :  { %v224_v4 = vsub.f32 %v3149_v38, %v218_v2  ;;  %v229_v5 = vmul.f32 %v223_v1, %v223_v1 }
 0x19d   :  { %v243_v6 = vsel %vm193_vm1, %v229_v5, 0.0  ;;  %v230_v7 = vmul.f32 %v224_v4, %v224_v4 }
 0x19e   :  { %244 = vadd.xlane.f32.xlu0 %v243_v6 }
 0x19f   :  { %v246_v8 = vsel %vm193_vm1, %v230_v7, 0.0 }
 0x1a0   :  { %247 = vadd.xlane.f32.xlu1 %v246_v8 }
 0x21b   :  { %v233_v11 = vpop.xlane.xlu0 %232 }
 0x21c   :  { %v249_v12 = vmul.f32 0.03125, %v233_v11 }
 0x21e   :  { %v255_v13 = vadd.f32 1e-05, %v249_v12 }
 0x21f   :  { %v236_v14 = vpop.xlane.xlu1 %235 }
 0x220   :  { %v250_v16 = vmul.f32 0.03125, %v236_v14  ;;  %2823 = vrsqrt.f32 %v255_v13 }
 0x222   :  { %v256_v17 = vadd.f32 1e-05, %v250_v16 }
 0x223   :  { %v239_v19 = vpop.xlane.xlu0 %238 }
 0x224   :  { %2825 = vrsqrt.f32 %v256_v17  ;;  %v251_v20 = vmul.f32 0.03125, %v239_v19 }
 0x226   :  { %v257_v21 = vadd.f32 1e-05, %v251_v20 }
 0x227   :  { %v242_v22 = vpop.xlane.xlu1 %241 }
 0x228   :  { %v252_v23 = vmul.f32 0.03125, %v242_v22  ;;  %2827 = vrsqrt.f32 %v257_v21 }
 0x22a   :  { %v258_v24 = vadd.f32 1e-05, %v252_v23  ;;  %v2824_v27 = vpop.eup %2823 }
 0x22b   :  { %v245_v26 = vpop.xlane.xlu0 %244  ;;  %v267_v34 = vmul.f32 %v2824_v27, %v3156_v44 }
 0x22c   :  { %2829 = vrsqrt.f32 %v258_v24  ;;  %v253_v29 = vmul.f32 0.03125, %v245_v26 }
 0x22d   :  { %v248_v30 = vpop.xlane.xlu1 %247 }
 0x22e   :  { %v2826_v31 = vpop.eup %2825  ;;  %v259_v32 = vadd.f32 1e-05, %v253_v29  ;;  %v254_v33 = vmul.f32 0.03125, %v248_v30  ;;  %v187_v29 = vld [vmem:[%s3922_s3] sm:$0xff] }
 0x22f   :  { %v268_v36 = vmul.f32 %v2826_v31, %v220_v48  ;;  %v188_v31 = vld [vmem:[%s3922_s3 + $0x8] sm:$0xff] }
 0x230   :  { %v260_v37 = vadd.f32 1e-05, %v254_v33  ;;  %2831 = vrsqrt.f32 %v259_v32 }
 0x231   :  { %v273_v39 = vpack.c.bf16 %v268_v36, %v267_v34 }
 0x232   :  { %2833 = vrsqrt.f32 %v260_v37  ;;  %v2828_v40 = vpop.eup %2827 }
 0x233   :  { %2521 = vmatmul.mubr.msk.bf16.vlgmr.msra.gmra.mrb[0].mxu1 %vm193_vm1, %v273_v39  ;;  %v269_v42 = vmul.f32 %v2828_v40, %v3163_v53 }
 0x234   :  { %2524 = vmatprep.mubr.msk.bf16.mxu1 %vm2998_vm0, %v2997_v0 }
 0x236   :  { %v2830_v41 = vpop.eup %2829 }
 0x237   :  { %v270_v43 = vmul.f32 %v2830_v41, %v222_v58  ;;  %v189_v41 = vld [vmem:[%s3922_s3 + $0x10] sm:$0xff] }
 0x239   :  { %v274_v45 = vpack.c.bf16 %v270_v43, %v269_v42  ;;  %v190_v43 = vld [vmem:[%s3922_s3 + $0x18] sm:$0xff] }
 0x23a   :  { %v2832_v46 = vpop.eup %2831 }
 0x23b   :  { %2525 = vmatmul.mubr.msk.bf16.gmra.mrb[4].mxu1 %vm193_vm1, %v274_v45  ;;  %v271_v48 = vmul.f32 %v2832_v46, %v223_v1 }
 0x23c   :  { %v2834_v44 = vpop.eup %2833  ;;  %2528 = vmatprep.mubr.msk.bf16.mxu1 %vm2998_vm0, %v2997_v0 }
 0x23d   :  { %v272_v47 = vmul.f32 %v2834_v44, %v224_v4 }
 0x23f   :  { %v275_v49 = vpack.c.bf16 %v272_v47, %v271_v48 }
 0x243   :  { %2529 = vmatmul.mubr.msk.bf16.gmra.mrb[8].mxu1 %vm193_vm1, %v275_v49 }
 0x244   :  { %2538 = vmatprep.mubr.msk.bf16.mxu1 %vm2998_vm0, %v2997_v0 }
 0x306   :  { %v342_v51 = vpop.f32.mrb[0].mxu1 }
 0x307   :  { %v2522_v52 = vpop.f32.mrb[1].mxu1  ;;  %v343_v54 = vadd.f32 %v2294_v50, %v342_v51 }
 0x308   :  { %v345_v53 = vpop.f32.mrb[2].mxu1 }
 0x309   :  { %v346_v55 = vadd.f32 %v2294_v50, %v345_v53  ;;  %v2523_v56 = vpop.f32.mrb[3].mxu1  ;;  %v192_v53 = vld [vmem:[%s3922_s3 + $0x28] sm:$0xff] }
 0x30b   :  { %v3197_v57 = vpack.c.bf16 %v346_v55, %v343_v54 }
 0x30d   :  { %371 = vrot.lane.b32.xlu0 %v3197_v57, %s2999_s30 }
 0x30e   :  { %v350_v58 = vpop.f32.mrb[4].mxu1 }
 0x30f   :  { %v2526_v59 = vpop.f32.mrb[5].mxu1  ;;  %v351_v61 = vadd.f32 %v2294_v50, %v350_v58 }
 0x310   :  { %v353_v60 = vpop.f32.mrb[6].mxu1 }
 0x311   :  { %v354_v62 = vadd.f32 %v2294_v50, %v353_v60  ;;  %v2527_v63 = vpop.f32.mrb[7].mxu1 }
 0x313   :  { %v3201_v1 = vpack.c.bf16 %v354_v62, %v351_v61 }
 0x315   :  { %606 = vrot.lane.b32.xlu0 %v3201_v1, %s3000_s11  ;;  %373 = vrot.lane.b32.xlu1 %v3201_v1, %s2999_s30 }
 0x316   :  { %v358_v2 = vpop.f32.mrb[8].mxu1 }
 0x317   :  { %v2530_v3 = vpop.f32.mrb[9].mxu1  ;;  %v359_v5 = vadd.f32 %v2294_v50, %v358_v2 }
 0x318   :  { %v361_v4 = vpop.f32.mrb[10].mxu1 }
 0x319   :  { %v362_v6 = vadd.f32 %v2294_v50, %v361_v4  ;;  %598 = vrot.lane.b32.xlu0 %v3197_v57, %s3001_s12  ;;  %v2531_v7 = vpop.f32.mrb[11].mxu1  ;;  %v191_v50 = vld [vmem:[%s3922_s3 + $0x20] sm:$0xff] }
 0x31b   :  { %v3209_v8 = vpack.c.bf16 %v362_v6, %v359_v5 }
 0x31d   :  { %602 = vrot.lane.b32.xlu0 %v3209_v8, %s3001_s12  ;;  %375 = vrot.lane.b32.xlu1 %v3209_v8, %s2999_s30 }
 0x321   :  { %604 = vrot.lane.b32.xlu1 %v3197_v57, %s3000_s11 }
 0x325   :  { %608 = vrot.lane.b32.xlu1 %v3209_v8, %s3000_s11 }
 0x329   :  { %600 = vrot.lane.b32.xlu1 %v3201_v1, %s3001_s12 }
 0x32d   :  { %523 = vrot.lane.b32.xlu1 %v3197_v57, %s3002_s1 }
 0x37f   :  { %v372_v9 = vpop.permute.xlu0 %371 }
 0x380   :  { %v388_v10 = vsel %vm377_vm2, %v372_v9, 0 }
 0x381   :  { %2533 = vmatpush3.bf16.xpose.msra.mxu1 %v388_v10 }
 0x382   :  { %2534 = vmatprep.subr.bf16.mxu1 %v2997_v0 }
 0x387   :  { %v374_v11 = vpop.permute.xlu1 %373  ;;  %v607_v21 = vpop.permute.xlu0 %606 }
 0x388   :  { %v391_v12 = vsel %vm377_vm2, %v374_v11, 0  ;;  %v623_v23 = vsel %vm377_vm2, %v607_v21, 0 }
 0x389   :  { %2535 = vmatpush3.bf16.xpose.msra.mxu1 %v391_v12 }
 0x38a   :  { %2536 = vmatprep.subr.bf16.mxu1 %v2997_v0 }
 0x38b   :  { %v599_v26 = vpop.permute.xlu0 %598 }
 0x38f   :  { %v376_v13 = vpop.permute.xlu1 %375  ;;  %v603_v27 = vpop.permute.xlu0 %602 }
 0x390   :  { %v394_v14 = vsel %vm377_vm2, %v376_v13, 0 }
 0x391   :  { %2537 = vmatpush3.bf16.xpose.msra.mxu1 %v394_v14 }
 0x392   :  { %2568 = vmatprep.subr.bf16.mxu1 %v2997_v0 }
 0x393   :  { %v605_v16 = vpop.permute.xlu1 %604 }
 0x394   :  { %v620_v19 = vsel %vm377_vm2, %v605_v16, 0 }
 0x397   :  { %v609_v17 = vpop.permute.xlu1 %608 }
 0x398   :  { %2539 = vmatmul.mubr.msk.bf16.vlgmr.msra.gmra.mrb[12].mxu1 %vm377_vm2, %v3197_v57  ;;  %v626_v24 = vsel %vm377_vm2, %v609_v17, 0 }
 0x399   :  { %2569 = vmatpush3.bf16.xpose.msra.mxu1 %v620_v19  ;;  %2542 = vmatprep.mubr.msk.bf16.mxu1 %vm2998_vm0, %v2997_v0 }
 0x39a   :  { %2570 = vmatprep.subr.bf16.mxu1 %v2997_v0 }
 0x39b   :  { %v601_v20 = vpop.permute.xlu1 %600 }
 0x39f   :  { %v524_v22 = vpop.permute.xlu1 %523 }
 0x3a0   :  { %2543 = vmatmul.mubr.msk.bf16.gmra.mrb[16].mxu1 %vm377_vm2, %v3201_v1  ;;  %2551 = vmatpush3.bf16.msra.mxu0 %v524_v22 }
 0x3a1   :  { %2571 = vmatpush3.bf16.xpose.msra.mxu1 %v623_v23  ;;  %2546 = vmatprep.mubr.msk.bf16.mxu1 %vm2998_vm0, %v2997_v0 }
 0x3a2   :  { %2572 = vmatprep.subr.bf16.mxu1 %v2997_v0  ;;  %2552 = vmatprep.subr.bf16.mxu0 %v2997_v0 }
 0x3a8   :  { %2547 = vmatmul.mubr.msk.bf16.gmra.mrb[20].mxu1 %vm377_vm2, %v3209_v8 }
 0x3a9   :  { %2573 = vmatpush3.bf16.xpose.msra.mxu1 %v626_v24  ;;  %2574 = vmatprep.mubr.msk.bf16.mxu1 %vm2998_vm0, %v2997_v0 }
 0x3aa   :  { %2604 = vmatprep.subr.bf16.mxu1 %v2997_v0 }
 0x3b0   :  { %2575 = vmatmul.mubr.msk.bf16.vlgmr.msra.gmra.mrb[24].mxu1 %vm377_vm2, %v599_v26 }
 0x3b1   :  { %2578 = vmatprep.mubr.msk.bf16.mxu1 %vm2998_vm0, %v2997_v0 }
 0x3b8   :  { %2579 = vmatmul.mubr.msk.bf16.gmra.mrb[28].mxu1 %vm377_vm2, %v601_v20 }
 0x3b9   :  { %2582 = vmatprep.mubr.msk.bf16.mxu1 %vm2998_vm0, %v2997_v0 }
 0x3c0   :  { %2583 = vmatmul.mubr.msk.bf16.gmra.mrb[32].mxu1 %vm377_vm2, %v603_v27 }
 0x3c1   :  { %2608 = vmatprep.mubr.msk.bf16.mxu1 %vm2998_vm0, %v2997_v0 }
 0x46b   :  { %v430_v30 = vpop.f32.mrb[12].mxu1 }
 0x46c   :  { %v3263_v32 = vadd.f32 %v430_v30, %v187_v29  ;;  %v2540_v33 = vpop.f32.mrb[13].mxu1 }
 0x46d   :  { %v433_v34 = vpop.f32.mrb[14].mxu1 }
 0x46e   :  { %v3265_v36 = vadd.f32 %v433_v34, %v188_v31  ;;  %v2541_v37 = vpop.f32.mrb[15].mxu1  ;;  %v454_v39 = vsel %vm453_vm3, %v3263_v32, -inf }
 0x46f   :  { %455 = vmax.xlane.f32.xlu1 %v454_v39 }
 0x470   :  { %v457_v40 = vsel %vm453_vm3, %v3265_v36, -inf }
 0x471   :  { %458 = vmax.xlane.f32.xlu0 %v457_v40 }
 0x473   :  { %v438_v42 = vpop.f32.mrb[16].mxu1 }
 0x474   :  { %v3277_v45 = vadd.f32 %v438_v42, %v189_v41  ;;  %v2544_v46 = vpop.f32.mrb[17].mxu1 }
 0x475   :  { %v441_v44 = vpop.f32.mrb[18].mxu1 }
 0x476   :  { %v442_v47 = vadd.f32 %v441_v44, %v190_v43  ;;  %v2545_v48 = vpop.f32.mrb[19].mxu1  ;;  %v460_v49 = vsel %vm453_vm3, %v3277_v45, -inf }
 0x477   :  { %461 = vmax.xlane.f32.xlu0 %v460_v49 }
 0x478   :  { %v463_v51 = vsel %vm453_vm3, %v442_v47, -inf }
 0x47b   :  { %464 = vmax.xlane.f32.xlu0 %v463_v51  ;;  %v446_v52 = vpop.f32.mrb[20].mxu1 }
 0x47c   :  { %v3288_v54 = vadd.f32 %v446_v52, %v191_v50  ;;  %v2548_v55 = vpop.f32.mrb[21].mxu1 }
 0x47d   :  { %v449_v56 = vpop.f32.mrb[22].mxu1 }
 0x47e   :  { %v450_v58 = vadd.f32 %v449_v56, %v192_v53  ;;  %v2549_v59 = vpop.f32.mrb[23].mxu1  ;;  %v466_v60 = vsel %vm453_vm3, %v3288_v54, -inf }
 0x47f   :  { %467 = vmax.xlane.f32.xlu1 %v466_v60 }
 0x480   :  { %v469_v61 = vsel %vm453_vm3, %v450_v58, -inf }
 0x481   :  { %470 = vmax.xlane.f32.xlu0 %v469_v61 }
 0x483   :  { %v662_v62 = vpop.f32.mrb[24].mxu1 }
 0x484   :  { %v3293_v63 = vadd.f32 %v662_v62, %v187_v29  ;;  %v2576_v2 = vpop.f32.mrb[25].mxu1 }
 0x485   :  { %v665_v3 = vpop.f32.mrb[26].mxu1 }
 0x486   :  { %v666_v4 = vadd.f32 %v665_v3, %v188_v31  ;;  %v2577_v5 = vpop.f32.mrb[27].mxu1  ;;  %v685_v6 = vsel %vm453_vm3, %v3293_v63, -inf }
 0x487   :  { %686 = vmax.xlane.f32.xlu1 %v685_v6 }
 0x488   :  { %v688_v7 = vsel %vm453_vm3, %v666_v4, -inf }
 0x489   :  { %689 = vmax.xlane.f32.xlu0 %v688_v7 }
 0x48b   :  { %v670_v9 = vpop.f32.mrb[28].mxu1 }
 0x48c   :  { %v671_v10 = vadd.f32 %v670_v9, %v189_v41  ;;  %v2580_v11 = vpop.f32.mrb[29].mxu1 }
 0x48d   :  { %v673_v12 = vpop.f32.mrb[30].mxu1 }
 0x48e   :  { %v674_v13 = vadd.f32 %v673_v12, %v190_v43  ;;  %v2581_v14 = vpop.f32.mrb[31].mxu1  ;;  %v691_v16 = vsel %vm453_vm3, %v671_v10, -inf }
 0x48f   :  { %692 = vmax.xlane.f32.xlu1 %v691_v16 }
 0x490   :  { %v694_v17 = vsel %vm453_vm3, %v674_v13, -inf }
 0x491   :  { %695 = vmax.xlane.f32.xlu0 %v694_v17 }
 0x493   :  { %v678_v19 = vpop.f32.mrb[32].mxu1 }
 0x494   :  { %v679_v20 = vadd.f32 %v678_v19, %v191_v50  ;;  %v2584_v21 = vpop.f32.mrb[33].mxu1 }
 0x495   :  { %v681_v22 = vpop.f32.mrb[34].mxu1 }
 0x496   :  { %v682_v23 = vadd.f32 %v681_v22, %v192_v53  ;;  %v2585_v24 = vpop.f32.mrb[35].mxu1  ;;  %v697_v26 = vsel %vm453_vm3, %v679_v20, -inf }
 0x497   :  { %698 = vmax.xlane.f32.xlu1 %v697_v26 }
 0x498   :  { %v700_v27 = vsel %vm453_vm3, %v682_v23, -inf }
 0x499   :  { %701 = vmax.xlane.f32.xlu0 %v700_v27 }
 0x4a8   :  { %527 = vrot.lane.b32.xlu1 %v3209_v8, %s3002_s1 }
 0x4af   :  { %525 = vrot.lane.b32.xlu0 %v3201_v1, %s3002_s1 }
 0x4fc   :  { %v456_v29 = vpop.xlane.xlu1 %455 }
 0x4fd   :  { %v472_v30 = vsub.f32 %v3263_v32, %v456_v29 }
 0x4fe   :  { %v459_v31 = vpop.xlane.xlu0 %458 }
 0x4ff   :  { %v478_v33 = vmul.f32 1.442695, %v472_v30  ;;  %v473_v34 = vsub.f32 %v3265_v36, %v459_v31 }
 0x501   :  { %2835 = vpow2.f32 %v478_v33  ;;  %v480_v37 = vmul.f32 1.442695, %v473_v34 }
 0x503   :  { %2837 = vpow2.f32 %v480_v37 }
 0x504   :  { %v462_v39 = vpop.xlane.xlu0 %461 }
 0x508   :  { %v465_v40 = vpop.xlane.xlu0 %464 }
 0x509   :  { %v475_v41 = vsub.f32 %v442_v47, %v465_v40 }
 0x50b   :  { %v3308_v42 = vpop.eup %2835  ;;  %v484_v43 = vmul.f32 1.442695, %v475_v41 }
 0x50c   :  { %v490_v46 = vsel %vm453_vm3, %v3308_v42, 0.0  ;;  %v468_v50 = vpop.xlane.xlu1 %467 }
 0x50d   :  { %v3312_v44 = vpop.eup %2837  ;;  %2839 = vpow2.f32 %v484_v43  ;;  %491 = vadd.xlane.f32.xlu1 %v490_v46  ;;  %v476_v22 = vsub.f32 %v3288_v54, %v468_v50 }
 0x50e   :  { %v471_v32 = vpop.xlane.xlu0 %470  ;;  %v493_v36 = vsel %vm453_vm3, %v3312_v44, 0.0 }
 0x50f   :  { %v477_v48 = vsub.f32 %v450_v58, %v471_v32  ;;  %494 = vadd.xlane.f32.xlu0 %v493_v36  ;;  %v486_v24 = vmul.f32 1.442695, %v476_v22 }
 0x511   :  { %v488_v49 = vmul.f32 1.442695, %v477_v48 }
 0x513   :  { %2841 = vpow2.f32 %v488_v49 }
 0x514   :  { %v687_v53 = vpop.xlane.xlu1 %686 }
 0x515   :  { %v703_v26 = vsub.f32 %v3293_v63, %v687_v53 }
 0x516   :  { %v690_v47 = vpop.xlane.xlu0 %689 }
 0x517   :  { %v3316_v51 = vpop.eup %2839  ;;  %v704_v52 = vsub.f32 %v666_v4, %v690_v47  ;;  %v709_v54 = vmul.f32 1.442695, %v703_v26 }
 0x518   :  { %v499_v55 = vsel %vm453_vm3, %v3316_v51, 0.0 }
 0x519   :  { %v711_v56 = vmul.f32 1.442695, %v704_v52  ;;  %500 = vadd.xlane.f32.xlu0 %v499_v55 }
 0x51b   :  { %2843 = vpow2.f32 %v711_v56 }
 0x51c   :  { %v693_v59 = vpop.xlane.xlu1 %692 }
 0x51d   :  { %v3320_v60 = vpop.eup %2841  ;;  %v705_v61 = vsub.f32 %v671_v10, %v693_v59 }
 0x51e   :  { %v696_v58 = vpop.xlane.xlu0 %695  ;;  %754 = vrot.lane.b32.xlu1 %v3197_v57, %s3003_s24  ;;  %v505_v62 = vsel %vm453_vm3, %v3320_v60, 0.0 }
 0x51f   :  { %v713_v2 = vmul.f32 1.442695, %v705_v61  ;;  %v706_v3 = vsub.f32 %v674_v13, %v696_v58  ;;  %506 = vadd.xlane.f32.xlu0 %v505_v62  ;;  %v474_v13 = vsub.f32 %v3277_v45, %v462_v39 }
 0x521   :  { %2845 = vpow2.f32 %v713_v2  ;;  %v715_v4 = vmul.f32 1.442695, %v706_v3  ;;  %v482_v21 = vmul.f32 1.442695, %v474_v13 }
 0x523   :  { %2847 = vpow2.f32 %v715_v4 }
 0x524   :  { %v699_v5 = vpop.xlane.xlu1 %698 }
 0x525   :  { %v3326_v6 = vpop.eup %2843  ;;  %v707_v7 = vsub.f32 %v679_v20, %v699_v5 }
 0x526   :  { %v702_v9 = vpop.xlane.xlu0 %701  ;;  %v724_v10 = vsel %vm453_vm3, %v3326_v6, 0.0 }
 0x527   :  { %v717_v11 = vmul.f32 1.442695, %v707_v7  ;;  %v708_v12 = vsub.f32 %v682_v23, %v702_v9  ;;  %725 = vadd.xlane.f32.xlu0 %v724_v10 }
 0x528   :  { %v528_v20 = vpop.permute.xlu1 %527 }
 0x529   :  { %2849 = vpow2.f32 %v717_v11  ;;  %v719_v57 = vmul.f32 1.442695, %v708_v12 }
 0x52a   :  { %v526_v14 = vpop.permute.xlu0 %525 }
 0x52b   :  { %v3330_v16 = vpop.eup %2845  ;;  %2851 = vpow2.f32 %v719_v57  ;;  %2553 = vmatpush3.bf16.msra.mxu0 %v526_v14 }
 0x52c   :  { %v727_v17 = vsel %vm453_vm3, %v3330_v16, 0.0  ;;  %2554 = vmatprep.subr.bf16.mxu0 %v2997_v0  ;;  %2853 = vpow2.f32 %v482_v21 }
 0x52d   :  { %v3336_v19 = vpop.eup %2847  ;;  %728 = vadd.xlane.f32.xlu0 %v727_v17  ;;  %2855 = vpow2.f32 %v486_v24 }
 0x52e   :  { %v730_v23 = vsel %vm453_vm3, %v3336_v19, 0.0  ;;  %2857 = vpow2.f32 %v709_v54 }
 0x52f   :  { %2555 = vmatpush3.bf16.msra.mxu0 %v528_v20 }
 0x530   :  { %2586 = vmatprep.subr.bf16.mxu0 %v2997_v0 }
 0x531   :  { %731 = vadd.xlane.f32.xlu0 %v730_v23 }
 0x533   :  { %v3342_v45 = vpop.eup %2849 }
 0x534   :  { %v733_v27 = vsel %vm453_vm3, %v3342_v45, 0.0 }
 0x535   :  { %v3347_v29 = vpop.eup %2851  ;;  %734 = vadd.xlane.f32.xlu0 %v733_v27 }
 0x536   :  { %v736_v30 = vsel %vm453_vm3, %v3347_v29, 0.0  ;;  %v2854_v31 = vpop.eup %2853 }
 0x537   :  { %v496_v33 = vsel %vm453_vm3, %v2854_v31, 0.0  ;;  %v2856_v34 = vpop.eup %2855 }
 0x538   :  { %v502_v63 = vsel %vm453_vm3, %v2856_v34, 0.0  ;;  %v2858_v37 = vpop.eup %2857 }
 0x539   :  { %737 = vadd.xlane.f32.xlu0 %v736_v30  ;;  %v721_v39 = vsel %vm453_vm3, %v2858_v37, 0.0 }
 0x542   :  { %497 = vadd.xlane.f32.xlu1 %v496_v33 }
 0x546   :  { %503 = vadd.xlane.f32.xlu1 %v502_v63 }
 0x54a   :  { %722 = vadd.xlane.f32.xlu1 %v721_v39 }
 0x54f   :  { %756 = vrot.lane.b32.xlu0 %v3201_v1, %s3003_s24 }
 0x55b   :  { %758 = vrot.lane.b32.xlu1 %v3209_v8, %s3003_s24 }
 0x59a   :  { %v492_v40 = vpop.xlane.xlu1 %491 }
 0x59b   :  { %2859 = vrcp.f32 %v492_v40 }
 0x59c   :  { %v495_v41 = vpop.xlane.xlu0 %494 }
 0x59d   :  { %2861 = vrcp.f32 %v495_v41 }
 0x59e   :  { %v755_v49 = vpop.permute.xlu1 %754 }
 0x5a5   :  { %v2860_v43 = vpop.eup %2859 }
 0x5a6   :  { %v514_v32 = vmul.f32 %v2860_v43, %v3308_v42  ;;  %v501_v1 = vpop.xlane.xlu0 %500 }
 0x5a7   :  { %v2862_v46 = vpop.eup %2861  ;;  %2863 = vrcp.f32 %v501_v1 }
 0x5a8   :  { %v515_v36 = vmul.f32 %v2862_v46, %v3312_v44 }
 0x5aa   :  { %v520_v48 = vpack.c.bf16 %v515_v36, %v514_v32 }
 0x5ac   :  { %2557 = vmatmul.mubr.msk.bf16.vlgmr.msra.gmra.mrb[12].mxu0 %vm453_vm3, %v520_v48  ;;  %v507_v8 = vpop.xlane.xlu0 %506 }
 0x5ad   :  { %2587 = vmatpush3.bf16.msra.mxu0 %v755_v49  ;;  %2560 = vmatprep.mubr.msk.bf16.mxu0 %vm2998_vm0, %v2997_v0 }
 0x5ae   :  { %2588 = vmatprep.subr.bf16.mxu0 %v2997_v0 }
 0x5b1   :  { %v2864_v61 = vpop.eup %2863 }
 0x5b2   :  { %v517_v3 = vmul.f32 %v2864_v61, %v3316_v51 }
 0x5b4   :  { %v726_v50 = vpop.xlane.xlu0 %725 }
 0x5ba   :  { %v729_v47 = vpop.xlane.xlu0 %728 }
 0x5be   :  { %v732_v52 = vpop.xlane.xlu0 %731 }
 0x5c2   :  { %v735_v53 = vpop.xlane.xlu0 %734 }
 0x5c6   :  { %v738_v55 = vpop.xlane.xlu0 %737 }
 0x5ca   :  { %v757_v42 = vpop.permute.xlu0 %756 }
 0x5cb   :  { %2589 = vmatpush3.bf16.msra.mxu0 %v757_v42 }
 0x5cc   :  { %2590 = vmatprep.subr.bf16.mxu0 %v2997_v0 }
 0x5cf   :  { %v498_v44 = vpop.xlane.xlu1 %497 }
 0x5d0   :  { %2865 = vrcp.f32 %v498_v44 }
 0x5d3   :  { %v504_v56 = vpop.xlane.xlu1 %503 }
 0x5d4   :  { %2867 = vrcp.f32 %v504_v56 }
 0x5d5   :  { %2869 = vrcp.f32 %v507_v8 }
 0x5d7   :  { %v723_v59 = vpop.xlane.xlu1 %722 }
 0x5d8   :  { %2871 = vrcp.f32 %v723_v59 }
 0x5d9   :  { %2873 = vrcp.f32 %v726_v50 }
 0x5da   :  { %v2866_v58 = vpop.eup %2865  ;;  %2875 = vrcp.f32 %v732_v52 }
 0x5db   :  { %v759_v62 = vpop.permute.xlu1 %758  ;;  %v516_v2 = vmul.f32 %v2866_v58, %v2854_v31  ;;  %2877 = vrcp.f32 %v729_v47 }
 0x5dc   :  { %2591 = vmatpush3.bf16.msra.mxu0 %v759_v62  ;;  %2879 = vrcp.f32 %v738_v55 }
 0x5dd   :  { %v521_v4 = vpack.c.bf16 %v517_v3, %v516_v2  ;;  %2620 = vmatprep.subr.bf16.mxu0 %v2997_v0  ;;  %2881 = vrcp.f32 %v735_v53 }
 0x5de   :  { %v2868_v5 = vpop.eup %2867 }
 0x5df   :  { %2561 = vmatmul.mubr.msk.bf16.gmra.mrb[16].mxu0 %vm453_vm3, %v521_v4  ;;  %v2870_v7 = vpop.eup %2869  ;;  %v518_v9 = vmul.f32 %v2868_v5, %v2856_v34 }
 0x5e0   :  { %2564 = vmatprep.mubr.msk.bf16.mxu0 %vm2998_vm0, %v2997_v0  ;;  %v519_v10 = vmul.f32 %v2870_v7, %v3320_v60 }
 0x5e2   :  { %v522_v11 = vpack.c.bf16 %v519_v10, %v518_v9  ;;  %v2872_v12 = vpop.eup %2871 }
 0x5e3   :  { %v2874_v51 = vpop.eup %2873  ;;  %v745_v57 = vmul.f32 %v2872_v12, %v2858_v37 }
 0x5e4   :  { %v746_v14 = vmul.f32 %v2874_v51, %v3326_v6  ;;  %v2876_v17 = vpop.eup %2875 }
 0x5e5   :  { %v2878_v60 = vpop.eup %2877  ;;  %v748_v20 = vmul.f32 %v2876_v17, %v3336_v19 }
 0x5e6   :  { %v751_v13 = vpack.c.bf16 %v746_v14, %v745_v57  ;;  %v747_v21 = vmul.f32 %v2878_v60, %v3330_v16  ;;  %v2880_v23 = vpop.eup %2879 }
 0x5e7   :  { %2565 = vmatmul.mubr.msk.bf16.gmra.mrb[20].mxu0 %vm453_vm3, %v522_v11  ;;  %v2882_v24 = vpop.eup %2881  ;;  %v750_v6 = vmul.f32 %v2880_v23, %v3347_v29 }
 0x5e8   :  { %2592 = vmatprep.mubr.msk.bf16.mxu0 %vm2998_vm0, %v2997_v0  ;;  %v752_v22 = vpack.c.bf16 %v748_v20, %v747_v21  ;;  %v749_v26 = vmul.f32 %v2882_v24, %v3342_v45 }
 0x5ea   :  { %v753_v27 = vpack.c.bf16 %v750_v6, %v749_v26 }
 0x5ef   :  { %2593 = vmatmul.mubr.msk.bf16.vlgmr.msra.gmra.mrb[24].mxu0 %vm453_vm3, %v751_v13 }
 0x5f0   :  { %2596 = vmatprep.mubr.msk.bf16.mxu0 %vm2998_vm0, %v2997_v0 }
 0x5f7   :  { %2597 = vmatmul.mubr.msk.bf16.gmra.mrb[28].mxu0 %vm453_vm3, %v752_v22 }
 0x5f8   :  { %2600 = vmatprep.mubr.msk.bf16.mxu0 %vm2998_vm0, %v2997_v0 }
 0x5ff   :  { %2601 = vmatmul.mubr.msk.bf16.gmra.mrb[32].mxu0 %vm453_vm3, %v753_v27 }
 0x600   :  { %2636 = vmatprep.mubr.msk.bf16.mxu0 %vm2998_vm0, %v2997_v0 }
 0x67f   :  { %v575_v19 = vpop.f32.mrb[12].mxu0 }
 0x680   :  { %v2558_v16 = vpop.f32.mrb[13].mxu0 }
 0x681   :  { %v578_v54 = vpop.f32.mrb[14].mxu0 }
 0x682   :  { %v2559_v30 = vpop.f32.mrb[15].mxu0 }
 0x6b2   :  { %v583_v31 = vpop.f32.mrb[16].mxu0 }
 0x6b3   :  { %v2562_v33 = vpop.f32.mrb[17].mxu0 }
 0x6b4   :  { %v586_v34 = vpop.f32.mrb[18].mxu0 }
 0x6b5   :  { %v2563_v63 = vpop.f32.mrb[19].mxu0 }
 0x6ba   :  { %v591_v37 = vpop.f32.mrb[20].mxu0 }
 0x6bb   :  { %v2566_v39 = vpop.f32.mrb[21].mxu0 }
 0x6bc   :  { %v594_v40 = vpop.f32.mrb[22].mxu0 }
 0x6bd   :  { %v2567_v29 = vpop.f32.mrb[23].mxu0 }
 0x6c2   :  { %v806_v41 = vpop.f32.mrb[24].mxu0 }
 0x6c3   :  { %835 = vrot.lane.b32.xlu1 %v806_v41, %s3004_s2  ;;  %v2594_v45 = vpop.f32.mrb[25].mxu0 }
 0x6c4   :  { %v809_v43 = vpop.f32.mrb[26].mxu0 }
 0x6c5   :  { %v2595_v46 = vpop.f32.mrb[27].mxu0 }
 0x6c6   :  { %v2801_v46 = vld [vmem:[%s3923_s6] sm:$0xff]  }
 0x6c7   :  { %837 = vrot.lane.b32.xlu1 %v809_v43, %s3004_s2  ;;  %2605 = vmatpush3.bf16.msra.mxu1 %v2801_v46 }
 0x6c8   :  { %2606 = vmatprep.subr.bf16.mxu1 %v2997_v0 }
 0x6ca   :  { %v814_v32 = vpop.f32.mrb[28].mxu0 }
 0x6cb   :  { %839 = vrot.lane.b32.xlu1 %v814_v32, %s3004_s2  ;;  %v2598_v36 = vpop.f32.mrb[29].mxu0  ;;  %v2802_v32 = vld [vmem:[%s3923_s6 + $0x8] sm:$0xff]  }
 0x6cc   :  { %v817_v48 = vpop.f32.mrb[30].mxu0  ;;  %2607 = vmatpush3.bf16.msra.mxu1 %v2802_v32 }
 0x6cd   :  { %v2599_v49 = vpop.f32.mrb[31].mxu0  ;;  %2648 = vmatprep.subr.bf16.mxu1 %v2997_v0 }
 0x6cf   :  { %841 = vrot.lane.b32.xlu1 %v817_v48, %s3004_s2 }
 0x6d2   :  { %v822_v1 = vpop.f32.mrb[32].mxu0 }
 0x6d3   :  { %843 = vrot.lane.b32.xlu1 %v822_v1, %s3004_s2  ;;  %v2602_v8 = vpop.f32.mrb[33].mxu0 }
 0x6d4   :  { %v825_v50 = vpop.f32.mrb[34].mxu0 }
 0x6d5   :  { %845 = vrot.lane.b32.xlu0 %v825_v50, %s3004_s2  ;;  %v2603_v47 = vpop.f32.mrb[35].mxu0 }
 0x735   :  { %v836_v52 = vpop.permute.xlu1 %835 }
 0x736   :  { %v853_v53 = vsel %vm377_vm2, %v575_v19, %v836_v52 }
 0x737   :  { %v3396_v55 = vadd.f32 %v853_v53, %v3119_v15 }
 0x739   :  { %v838_v42 = vpop.permute.xlu1 %837  ;;  %v865_v44 = vsel %vm193_vm1, %v3396_v55, 0.0 }
 0x73a   :  { %v854_v56 = vsel %vm377_vm2, %v578_v54, %v838_v42  ;;  %866 = vadd.xlane.f32.xlu1 %v865_v44 }
 0x73b   :  { %v3402_v59 = vadd.f32 %v854_v56, %v3121_v18 }
 0x73d   :  { %v840_v61 = vpop.permute.xlu1 %839  ;;  %v868_v58 = vsel %vm193_vm1, %v3402_v59, 0.0 }
 0x73e   :  { %v855_v62 = vsel %vm377_vm2, %v583_v31, %v840_v61  ;;  %869 = vadd.xlane.f32.xlu0 %v868_v58 }
 0x73f   :  { %v3408_v15 = vadd.f32 %v855_v62, %v3133_v25 }
 0x741   :  { %v842_v2 = vpop.permute.xlu1 %841  ;;  %v871_v3 = vsel %vm193_vm1, %v3408_v15, 0.0 }
 0x742   :  { %v856_v4 = vsel %vm377_vm2, %v586_v34, %v842_v2  ;;  %872 = vadd.xlane.f32.xlu0 %v871_v3 }
 0x743   :  { %v3414_v18 = vadd.f32 %v856_v4, %v3135_v28 }
 0x745   :  { %v844_v5 = vpop.permute.xlu1 %843  ;;  %v874_v7 = vsel %vm193_vm1, %v3414_v18, 0.0 }
 0x746   :  { %v857_v9 = vsel %vm377_vm2, %v591_v37, %v844_v5  ;;  %875 = vadd.xlane.f32.xlu0 %v874_v7 }
 0x747   :  { %v3420_v25 = vadd.f32 %v857_v9, %v3147_v35  ;;  %v846_v10 = vpop.permute.xlu0 %845 }
 0x748   :  { %v858_v11 = vsel %vm377_vm2, %v594_v40, %v846_v10 }
 0x749   :  { %v3424_v12 = vadd.f32 %v858_v11, %v3149_v38  ;;  %v877_v28 = vsel %vm193_vm1, %v3420_v25, 0.0 }
 0x74a   :  { %878 = vadd.xlane.f32.xlu1 %v877_v28 }
 0x74b   :  { %v880_v51 = vsel %vm193_vm1, %v3424_v12, 0.0 }
 0x74c   :  { %881 = vadd.xlane.f32.xlu0 %v880_v51 }
 0x7c7   :  { %v867_v57 = vpop.xlane.xlu1 %866 }
 0x7c8   :  { %v883_v14 = vmul.f32 0.03125, %v867_v57 }
 0x7ca   :  { %v3431_v13 = vsub.f32 %v3396_v55, %v883_v14 }
 0x7cb   :  { %v870_v35 = vpop.xlane.xlu0 %869 }
 0x7cc   :  { %v884_v17 = vmul.f32 0.03125, %v870_v35  ;;  %v895_v60 = vmul.f32 %v3431_v13, %v3431_v13 }
 0x7ce   :  { %v890_v38 = vsub.f32 %v3402_v59, %v884_v17  ;;  %v901_v20 = vsel %vm193_vm1, %v895_v60, 0.0 }
 0x7cf   :  { %902 = vadd.xlane.f32.xlu1 %v901_v20  ;;  %v873_v21 = vpop.xlane.xlu0 %872 }
 0x7d0   :  { %v885_v22 = vmul.f32 0.03125, %v873_v21  ;;  %v896_v23 = vmul.f32 %v890_v38, %v890_v38  ;;  %v2803_v21 = vld [vmem:[%s3924_s8] sm:$0xff]  }
 0x7d1   :  { %2621 = vmatpush3.bf16.msra.mxu0 %v2803_v21 }
 0x7d2   :  { %v3438_v24 = vsub.f32 %v3408_v15, %v885_v22  ;;  %v904_v6 = vsel %vm193_vm1, %v896_v23, 0.0  ;;  %2622 = vmatprep.subr.bf16.mxu0 %v2997_v0  ;;  %v2804_v22 = vld [vmem:[%s3924_s8 + $0x8] sm:$0xff]   ;;  %v2805_v23 = vld [vmem:[%s3924_s8 + $0x10] sm:$0xff]  }
 0x7d3   :  { %905 = vadd.xlane.f32.xlu0 %v904_v6  ;;  %v876_v26 = vpop.xlane.xlu0 %875  ;;  %v2807_v6 = vld [vmem:[%s3924_s8 + $0x20] sm:$0xff]  }
 0x7d4   :  { %v886_v27 = vmul.f32 0.03125, %v876_v26  ;;  %v897_v19 = vmul.f32 %v3438_v24, %v3438_v24  ;;  %v2808_v26 = vld [vmem:[%s3924_s8 + $0x28] sm:$0xff]  }
 0x7d5   :  { %2623 = vmatpush3.bf16.msra.mxu0 %v2804_v22 }
 0x7d6   :  { %v892_v16 = vsub.f32 %v3414_v18, %v886_v27  ;;  %v907_v54 = vsel %vm193_vm1, %v897_v19, 0.0  ;;  %2624 = vmatprep.subr.bf16.mxu0 %v2997_v0  ;;  %v2809_v27 = vld [vmem:[%s3924_s8 + $0x30] sm:$0xff]   ;;  %v2810_v19 = vld [vmem:[%s3924_s8 + $0x38] sm:$0xff]  }
 0x7d7   :  { %v879_v30 = vpop.xlane.xlu1 %878  ;;  %908 = vadd.xlane.f32.xlu1 %v907_v54 }
 0x7d8   :  { %v887_v31 = vmul.f32 0.03125, %v879_v30  ;;  %v898_v33 = vmul.f32 %v892_v16, %v892_v16 }
 0x7d9   :  { %v882_v34 = vpop.xlane.xlu0 %881  ;;  %2625 = vmatpush3.bf16.msra.mxu0 %v2805_v23 }
 0x7da   :  { %v893_v63 = vsub.f32 %v3420_v25, %v887_v31  ;;  %v888_v37 = vmul.f32 0.03125, %v882_v34  ;;  %v910_v39 = vsel %vm193_vm1, %v898_v33, 0.0  ;;  %2626 = vmatprep.subr.bf16.mxu0 %v2997_v0 }
 0x7db   :  { %911 = vadd.xlane.f32.xlu0 %v910_v39 }
 0x7dc   :  { %v894_v40 = vsub.f32 %v3424_v12, %v888_v37  ;;  %v899_v29 = vmul.f32 %v893_v63, %v893_v63 }
 0x7de   :  { %v913_v41 = vsel %vm193_vm1, %v899_v29, 0.0  ;;  %v900_v45 = vmul.f32 %v894_v40, %v894_v40 }
 0x7df   :  { %914 = vadd.xlane.f32.xlu1 %v913_v41 }
 0x7e0   :  { %v916_v43 = vsel %vm193_vm1, %v900_v45, 0.0 }
 0x7e1   :  { %917 = vadd.xlane.f32.xlu0 %v916_v43 }
 0x85c   :  { %v903_v36 = vpop.xlane.xlu1 %902 }
 0x85d   :  { %v919_v48 = vmul.f32 0.03125, %v903_v36 }
 0x85f   :  { %v925_v49 = vadd.f32 1e-05, %v919_v48 }
 0x860   :  { %v906_v1 = vpop.xlane.xlu0 %905 }
 0x861   :  { %v920_v8 = vmul.f32 0.03125, %v906_v1  ;;  %2883 = vrsqrt.f32 %v925_v49 }
 0x863   :  { %v926_v50 = vadd.f32 1e-05, %v920_v8 }
 0x864   :  { %v909_v47 = vpop.xlane.xlu1 %908 }
 0x865   :  { %2885 = vrsqrt.f32 %v926_v50  ;;  %v921_v52 = vmul.f32 0.03125, %v909_v47 }
 0x867   :  { %v927_v53 = vadd.f32 1e-05, %v921_v52 }
 0x868   :  { %v912_v42 = vpop.xlane.xlu0 %911 }
 0x869   :  { %v922_v44 = vmul.f32 0.03125, %v912_v42  ;;  %2887 = vrsqrt.f32 %v927_v53 }
 0x86b   :  { %v928_v56 = vadd.f32 1e-05, %v922_v44  ;;  %v2884_v58 = vpop.eup %2883 }
 0x86c   :  { %v915_v61 = vpop.xlane.xlu1 %914  ;;  %v937_v7 = vmul.f32 %v2884_v58, %v3431_v13 }
 0x86d   :  { %2889 = vrsqrt.f32 %v928_v56  ;;  %v923_v62 = vmul.f32 0.03125, %v915_v61 }
 0x86e   :  { %v918_v2 = vpop.xlane.xlu0 %917 }
 0x86f   :  { %v2886_v3 = vpop.eup %2885  ;;  %v929_v4 = vadd.f32 1e-05, %v923_v62  ;;  %v924_v5 = vmul.f32 0.03125, %v918_v2 }
 0x870   :  { %v938_v9 = vmul.f32 %v2886_v3, %v890_v38 }
 0x871   :  { %v930_v10 = vadd.f32 1e-05, %v924_v5  ;;  %2891 = vrsqrt.f32 %v929_v4 }
 0x872   :  { %v943_v11 = vpack.c.bf16 %v938_v9, %v937_v7 }
 0x873   :  { %2893 = vrsqrt.f32 %v930_v10  ;;  %v2888_v28 = vpop.eup %2887 }
 0x874   :  { %2609 = vmatmul.mubr.msk.bf16.vlgmr.msra.gmra.mrb[36].mxu1 %vm193_vm1, %v943_v11  ;;  %v939_v57 = vmul.f32 %v2888_v28, %v3438_v24  ;;  %v2806_v24 = vld [vmem:[%s3924_s8 + $0x18] sm:$0xff]  }
 0x875   :  { %2612 = vmatprep.mubr.msk.bf16.mxu1 %vm2998_vm0, %v2997_v0  ;;  %2627 = vmatpush3.bf16.msra.mxu0 %v2806_v24 }
 0x876   :  { %2628 = vmatprep.subr.bf16.mxu0 %v2997_v0 }
 0x877   :  { %v2890_v51 = vpop.eup %2889 }
 0x878   :  { %v940_v14 = vmul.f32 %v2890_v51, %v892_v16  ;;  %v2312_v16 = vld [vmem:[%s3925_s7] ss:$0 sm:$0xff] }
 0x879   :  { %2629 = vmatpush3.bf16.msra.mxu0 %v2807_v6 }
 0x87a   :  { %v944_v35 = vpack.c.bf16 %v940_v14, %v939_v57  ;;  %2630 = vmatprep.subr.bf16.mxu0 %v2997_v0 }
 0x87b   :  { %v2892_v17 = vpop.eup %2891 }
 0x87c   :  { %2613 = vmatmul.mubr.msk.bf16.gmra.mrb[40].mxu1 %vm193_vm1, %v944_v35  ;;  %v941_v38 = vmul.f32 %v2892_v17, %v893_v63 }
 0x87d   :  { %v2894_v13 = vpop.eup %2893  ;;  %2616 = vmatprep.mubr.msk.bf16.mxu1 %vm2998_vm0, %v2997_v0  ;;  %2631 = vmatpush3.bf16.msra.mxu0 %v2808_v26 }
 0x87e   :  { %v942_v60 = vmul.f32 %v2894_v13, %v894_v40  ;;  %2632 = vmatprep.subr.bf16.mxu0 %v2997_v0 }
 0x880   :  { %v945_v20 = vpack.c.bf16 %v942_v60, %v941_v38 }
 0x881   :  { %2633 = vmatpush3.bf16.msra.mxu0 %v2809_v27 }
 0x882   :  { %2634 = vmatprep.subr.bf16.mxu0 %v2997_v0 }
 0x884   :  { %2617 = vmatmul.mubr.msk.bf16.gmra.mrb[44].mxu1 %vm193_vm1, %v945_v20 }
 0x885   :  { %2652 = vmatprep.mubr.msk.bf16.mxu1 %vm2998_vm0, %v2997_v0  ;;  %2635 = vmatpush3.bf16.msra.mxu0 %v2810_v19 }
 0x886   :  { %2682 = vmatprep.subr.bf16.mxu0 %v2997_v0 }
 0x947   :  { %v1012_v54 = vpop.f32.mrb[36].mxu1 }
 0x948   :  { %v1013_v30 = vadd.f32 %v2312_v16, %v1012_v54  ;;  %v2610_v31 = vpop.f32.mrb[37].mxu1 }
 0x949   :  { %v1015_v33 = vpop.f32.mrb[38].mxu1 }
 0x94a   :  { %v1035_v34 = vmul.f32 %v1013_v30, %v1013_v30  ;;  %v1016_v63 = vadd.f32 %v2312_v16, %v1015_v33  ;;  %v2611_v37 = vpop.f32.mrb[39].mxu1 }
 0x94c   :  { %v1041_v39 = vmul.f32 %v1035_v34, %v1013_v30  ;;  %v1036_v40 = vmul.f32 %v1016_v63, %v1016_v63 }
 0x94e   :  { %v1047_v29 = vmul.f32 0.044715, %v1041_v39  ;;  %v1042_v41 = vmul.f32 %v1036_v40, %v1016_v63 }
 0x94f   :  { %v1020_v45 = vpop.f32.mrb[40].mxu1 }
 0x950   :  { %v1053_v43 = vadd.f32 %v1047_v29, %v1013_v30  ;;  %v1048_v46 = vmul.f32 0.044715, %v1042_v41  ;;  %v1021_v32 = vadd.f32 %v2312_v16, %v1020_v45  ;;  %v2614_v36 = vpop.f32.mrb[41].mxu1 }
 0x951   :  { %v1023_v48 = vpop.f32.mrb[42].mxu1 }
 0x952   :  { %v1059_v49 = vmul.f32 0.7978846, %v1053_v43  ;;  %v1054_v1 = vadd.f32 %v1048_v46, %v1016_v63  ;;  %v1037_v8 = vmul.f32 %v1021_v32, %v1021_v32  ;;  %v1024_v50 = vadd.f32 %v2312_v16, %v1023_v48  ;;  %v2615_v47 = vpop.f32.mrb[43].mxu1 }
 0x954   :  { %2895 = vtanh.f32 %v1059_v49  ;;  %v1060_v52 = vmul.f32 0.7978846, %v1054_v1  ;;  %v1043_v53 = vmul.f32 %v1037_v8, %v1021_v32  ;;  %v1038_v42 = vmul.f32 %v1024_v50, %v1024_v50  ;;  %v2326_v8 = vld [vmem:[%s3926_s9] ss:$0 sm:$0xff] }
 0x956   :  { %2897 = vtanh.f32 %v1060_v52  ;;  %v1049_v44 = vmul.f32 0.044715, %v1043_v53  ;;  %v1044_v56 = vmul.f32 %v1038_v42, %v1024_v50 }
 0x957   :  { %v1028_v61 = vpop.f32.mrb[44].mxu1 }
 0x958   :  { %v1055_v58 = vadd.f32 %v1049_v44, %v1021_v32  ;;  %v1050_v62 = vmul.f32 0.044715, %v1044_v56  ;;  %v1029_v2 = vadd.f32 %v2312_v16, %v1028_v61  ;;  %v2618_v3 = vpop.f32.mrb[45].mxu1 }
 0x959   :  { %v1031_v4 = vpop.f32.mrb[46].mxu1 }
 0x95a   :  { %v1061_v5 = vmul.f32 0.7978846, %v1055_v58  ;;  %v1056_v7 = vadd.f32 %v1050_v62, %v1024_v50  ;;  %v1039_v9 = vmul.f32 %v1029_v2, %v1029_v2  ;;  %v1032_v10 = vadd.f32 %v2312_v16, %v1031_v4  ;;  %v2619_v11 = vpop.f32.mrb[47].mxu1 }
 0x95c   :  { %2899 = vtanh.f32 %v1061_v5  ;;  %v1062_v28 = vmul.f32 0.7978846, %v1056_v7  ;;  %v1045_v51 = vmul.f32 %v1039_v9, %v1029_v2  ;;  %v1040_v57 = vmul.f32 %v1032_v10, %v1032_v10 }
 0x95e   :  { %v2896_v14 = vpop.eup %2895  ;;  %2901 = vtanh.f32 %v1062_v28  ;;  %v1051_v35 = vmul.f32 0.044715, %v1045_v51  ;;  %v1046_v17 = vmul.f32 %v1040_v57, %v1032_v10 }
 0x95f   :  { %v1071_v13 = vadd.f32 1.0, %v2896_v14 }
 0x960   :  { %v2898_v60 = vpop.eup %2897  ;;  %v1057_v38 = vadd.f32 %v1051_v35, %v1029_v2  ;;  %v1052_v20 = vmul.f32 0.044715, %v1046_v17 }
 0x961   :  { %v1077_v21 = vmul.f32 0.5, %v1071_v13  ;;  %v1072_v22 = vadd.f32 1.0, %v2898_v60 }
 0x962   :  { %v1063_v23 = vmul.f32 0.7978846, %v1057_v38  ;;  %v1058_v24 = vadd.f32 %v1052_v20, %v1032_v10 }
 0x963   :  { %v1078_v6 = vmul.f32 0.5, %v1072_v22  ;;  %v1083_v27 = vmul.f32 %v1077_v21, %v1013_v30 }
 0x964   :  { %2903 = vtanh.f32 %v1063_v23  ;;  %v1064_v26 = vmul.f32 0.7978846, %v1058_v24 }
 0x965   :  { %v1084_v19 = vmul.f32 %v1078_v6, %v1016_v63 }
 0x966   :  { %v2900_v16 = vpop.eup %2899  ;;  %2905 = vtanh.f32 %v1064_v26 }
 0x967   :  { %v1089_v54 = vpack.c.bf16 %v1084_v19, %v1083_v27  ;;  %v1073_v31 = vadd.f32 1.0, %v2900_v16 }
 0x968   :  { %v2902_v33 = vpop.eup %2901 }
 0x969   :  { %2637 = vmatmul.mubr.bf16.vlgmr.msra.gmra.mrb[36].mxu0 %v1089_v54  ;;  %v1074_v34 = vadd.f32 1.0, %v2902_v33  ;;  %v1079_v37 = vmul.f32 0.5, %v1073_v31 }
 0x96a   :  { %2640 = vmatprep.mubr.msk.bf16.mxu0 %vm2998_vm0, %v2997_v0 }
 0x96b   :  { %v1080_v39 = vmul.f32 0.5, %v1074_v34  ;;  %v1085_v40 = vmul.f32 %v1079_v37, %v1021_v32 }
 0x96d   :  { %v1086_v29 = vmul.f32 %v1080_v39, %v1024_v50 }
 0x96e   :  { %v2904_v41 = vpop.eup %2903 }
 0x96f   :  { %v1090_v45 = vpack.c.bf16 %v1086_v29, %v1085_v40  ;;  %v1075_v43 = vadd.f32 1.0, %v2904_v41 }
 0x970   :  { %v2906_v46 = vpop.eup %2905 }
 0x971   :  { %2641 = vmatmul.mubr.bf16.gmra.mrb[40].mxu0 %v1090_v45  ;;  %v1076_v30 = vadd.f32 1.0, %v2906_v46  ;;  %v1081_v63 = vmul.f32 0.5, %v1075_v43 }
 0x972   :  { %2644 = vmatprep.mubr.msk.bf16.mxu0 %vm2998_vm0, %v2997_v0 }
 0x973   :  { %v1082_v36 = vmul.f32 0.5, %v1076_v30  ;;  %v1087_v48 = vmul.f32 %v1081_v63, %v1029_v2 }
 0x975   :  { %v1088_v49 = vmul.f32 %v1082_v36, %v1032_v10 }
 0x977   :  { %v1091_v1 = vpack.c.bf16 %v1088_v49, %v1087_v48  ;;  %v2811_v49 = vld [vmem:[%s3920_s4 + $0x10] sm:$0xff]  }
 0x978   :  { %2649 = vmatpush3.bf16.msra.mxu1 %v2811_v49 }
 0x979   :  { %2645 = vmatmul.mubr.bf16.gmra.mrb[44].mxu0 %v1091_v1  ;;  %2650 = vmatprep.subr.bf16.mxu1 %v2997_v0  ;;  %v2812_v1 = vld [vmem:[%s3920_s4 + $0x18] sm:$0xff]  }
 0x97a   :  { %2688 = vmatprep.mubr.msk.bf16.mxu0 %vm2998_vm0, %v2997_v0 }
 0x97c   :  { %2651 = vmatpush3.bf16.msra.mxu1 %v2812_v1 }
 0x97d   :  { %2664 = vmatprep.subr.bf16.mxu1 %v2997_v0 }
 0xa3c   :  { %v1190_v32 = vpop.f32.mrb[36].mxu0 }
 0xa3d   :  { %v1213_v50 = vadd.f32 %v1190_v32, %v3396_v55  ;;  %v2638_v47 = vpop.f32.mrb[37].mxu0 }
 0xa3e   :  { %v1193_v52 = vpop.f32.mrb[38].mxu0 }
 0xa3f   :  { %v3514_v53 = vadd.f32 %v2326_v8, %v1213_v50  ;;  %v1214_v42 = vadd.f32 %v1193_v52, %v3402_v59  ;;  %v2639_v44 = vpop.f32.mrb[39].mxu0 }
 0xa41   :  { %v3517_v56 = vadd.f32 %v2326_v8, %v1214_v42  ;;  %v1232_v61 = vsel %vm193_vm1, %v3514_v53, 0.0 }
 0xa42   :  { %1233 = vadd.xlane.f32.xlu1 %v1232_v61 }
 0xa43   :  { %v1235_v58 = vsel %vm193_vm1, %v3517_v56, 0.0 }
 0xa44   :  { %1236 = vadd.xlane.f32.xlu0 %v1235_v58  ;;  %v1198_v62 = vpop.f32.mrb[40].mxu0 }
 0xa45   :  { %v1215_v55 = vadd.f32 %v1198_v62, %v3408_v15  ;;  %v2642_v2 = vpop.f32.mrb[41].mxu0 }
 0xa46   :  { %v1201_v3 = vpop.f32.mrb[42].mxu0 }
 0xa47   :  { %v3524_v4 = vadd.f32 %v2326_v8, %v1215_v55  ;;  %v1216_v59 = vadd.f32 %v1201_v3, %v3414_v18  ;;  %v2643_v5 = vpop.f32.mrb[43].mxu0 }
 0xa49   :  { %v3527_v7 = vadd.f32 %v2326_v8, %v1216_v59  ;;  %v1238_v9 = vsel %vm193_vm1, %v3524_v4, 0.0 }
 0xa4a   :  { %1239 = vadd.xlane.f32.xlu1 %v1238_v9 }
 0xa4b   :  { %v1241_v10 = vsel %vm193_vm1, %v3527_v7, 0.0 }
 0xa4c   :  { %1242 = vadd.xlane.f32.xlu0 %v1241_v10  ;;  %v1206_v11 = vpop.f32.mrb[44].mxu0 }
 0xa4d   :  { %v1217_v15 = vadd.f32 %v1206_v11, %v3420_v25  ;;  %v2646_v28 = vpop.f32.mrb[45].mxu0 }
 0xa4e   :  { %v1209_v51 = vpop.f32.mrb[46].mxu0 }
 0xa4f   :  { %v3534_v57 = vadd.f32 %v2326_v8, %v1217_v15  ;;  %v1218_v18 = vadd.f32 %v1209_v51, %v3424_v12  ;;  %v2647_v14 = vpop.f32.mrb[47].mxu0 }
 0xa51   :  { %v3537_v35 = vadd.f32 %v2326_v8, %v1218_v18  ;;  %v1244_v17 = vsel %vm193_vm1, %v3534_v57, 0.0 }
 0xa52   :  { %1245 = vadd.xlane.f32.xlu1 %v1244_v17 }
 0xa53   :  { %v1247_v13 = vsel %vm193_vm1, %v3537_v35, 0.0 }
 0xa54   :  { %1248 = vadd.xlane.f32.xlu0 %v1247_v13 }
 0xacf   :  { %v1234_v60 = vpop.xlane.xlu1 %1233 }
 0xad0   :  { %v1250_v38 = vmul.f32 0.03125, %v1234_v60 }
 0xad1   :  { %v1237_v25 = vpop.xlane.xlu0 %1236 }
 0xad2   :  { %v1256_v20 = vsub.f32 %v3514_v53, %v1250_v38  ;;  %v1251_v21 = vmul.f32 0.03125, %v1237_v25 }
 0xad4   :  { %v1257_v22 = vsub.f32 %v3517_v56, %v1251_v21  ;;  %v1262_v12 = vmul.f32 %v1256_v20, %v1256_v20 }
 0xad6   :  { %v1268_v23 = vsel %vm193_vm1, %v1262_v12, 0.0  ;;  %v1263_v24 = vmul.f32 %v1257_v22, %v1257_v22 }
 0xad7   :  { %v1240_v6 = vpop.xlane.xlu1 %1239  ;;  %1269 = vadd.xlane.f32.xlu1 %v1268_v23 }
 0xad8   :  { %v1252_v26 = vmul.f32 0.03125, %v1240_v6  ;;  %v1271_v27 = vsel %vm193_vm1, %v1263_v24, 0.0  ;;  %v2332_v24 = vld [vmem:[%s3921_s5 + $0x1] ss:$0 sm:$0xff] }
 0xad9   :  { %v1243_v19 = vpop.xlane.xlu0 %1242  ;;  %1272 = vadd.xlane.f32.xlu0 %v1271_v27 }
 0xada   :  { %v1258_v16 = vsub.f32 %v3524_v4, %v1252_v26  ;;  %v1253_v54 = vmul.f32 0.03125, %v1243_v19 }
 0xadc   :  { %v1259_v31 = vsub.f32 %v3527_v7, %v1253_v54  ;;  %v1264_v33 = vmul.f32 %v1258_v16, %v1258_v16 }
 0xade   :  { %v1274_v34 = vsel %vm193_vm1, %v1264_v33, 0.0  ;;  %v1265_v37 = vmul.f32 %v1259_v31, %v1259_v31 }
 0xadf   :  { %1275 = vadd.xlane.f32.xlu1 %v1274_v34  ;;  %v1246_v39 = vpop.xlane.xlu1 %1245 }
 0xae0   :  { %v1254_v40 = vmul.f32 0.03125, %v1246_v39  ;;  %v1277_v29 = vsel %vm193_vm1, %v1265_v37, 0.0 }
 0xae1   :  { %1278 = vadd.xlane.f32.xlu0 %v1277_v29  ;;  %v1249_v41 = vpop.xlane.xlu0 %1248 }
 0xae2   :  { %v1260_v45 = vsub.f32 %v3534_v57, %v1254_v40  ;;  %v1255_v43 = vmul.f32 0.03125, %v1249_v41 }
 0xae4   :  { %v1261_v46 = vsub.f32 %v3537_v35, %v1255_v43  ;;  %v1266_v30 = vmul.f32 %v1260_v45, %v1260_v45 }
 0xae6   :  { %v1280_v63 = vsel %vm193_vm1, %v1266_v30, 0.0  ;;  %v1267_v36 = vmul.f32 %v1261_v46, %v1261_v46 }
 0xae7   :  { %1281 = vadd.xlane.f32.xlu1 %v1280_v63 }
 0xae8   :  { %v1283_v48 = vsel %vm193_vm1, %v1267_v36, 0.0 }
 0xae9   :  { %1284 = vadd.xlane.f32.xlu0 %v1283_v48 }
 0xb64   :  { %v1270_v32 = vpop.xlane.xlu1 %1269 }
 0xb65   :  { %v1286_v8 = vmul.f32 0.03125, %v1270_v32 }
 0xb66   :  { %v1273_v50 = vpop.xlane.xlu0 %1272 }
 0xb67   :  { %v1292_v47 = vadd.f32 1e-05, %v1286_v8  ;;  %v1287_v52 = vmul.f32 0.03125, %v1273_v50 }
 0xb69   :  { %2907 = vrsqrt.f32 %v1292_v47  ;;  %v1293_v42 = vadd.f32 1e-05, %v1287_v52 }
 0xb6b   :  { %2909 = vrsqrt.f32 %v1293_v42 }
 0xb6c   :  { %v1276_v44 = vpop.xlane.xlu1 %1275 }
 0xb6d   :  { %v1288_v61 = vmul.f32 0.03125, %v1276_v44 }
 0xb6e   :  { %v1279_v58 = vpop.xlane.xlu0 %1278 }
 0xb6f   :  { %v1294_v62 = vadd.f32 1e-05, %v1288_v61  ;;  %v1289_v55 = vmul.f32 0.03125, %v1279_v58 }
 0xb71   :  { %2911 = vrsqrt.f32 %v1294_v62  ;;  %v1295_v2 = vadd.f32 1e-05, %v1289_v55 }
 0xb73   :  { %v2908_v3 = vpop.eup %2907  ;;  %2913 = vrsqrt.f32 %v1295_v2 }
 0xb74   :  { %v1282_v59 = vpop.xlane.xlu1 %1281  ;;  %v1304_v10 = vmul.f32 %v2908_v3, %v1256_v20 }
 0xb75   :  { %v2910_v5 = vpop.eup %2909  ;;  %v1290_v9 = vmul.f32 0.03125, %v1282_v59 }
 0xb76   :  { %v1305_v11 = vmul.f32 %v2910_v5, %v1257_v22  ;;  %v1285_v15 = vpop.xlane.xlu0 %1284  ;;  %v2991_v5 = vld [vmem:[%s3922_s3] sm:$0xff] }
 0xb77   :  { %v1296_v28 = vadd.f32 1e-05, %v1290_v9  ;;  %v1291_v51 = vmul.f32 0.03125, %v1285_v15  ;;  %v2992_v15 = vld [vmem:[%s3922_s3 + $0x8] sm:$0xff] }
 0xb78   :  { %v1310_v18 = vpack.c.bf16 %v1305_v11, %v1304_v10 }
 0xb79   :  { %2915 = vrsqrt.f32 %v1296_v28  ;;  %v1297_v14 = vadd.f32 1e-05, %v1291_v51 }
 0xb7a   :  { %2653 = vmatmul.mubr.msk.bf16.vlgmr.msra.gmra.mrb[48].mxu1 %vm193_vm1, %v1310_v18 }
 0xb7b   :  { %v2912_v17 = vpop.eup %2911  ;;  %2917 = vrsqrt.f32 %v1297_v14  ;;  %2656 = vmatprep.mubr.msk.bf16.mxu1 %vm2998_vm0, %v2997_v0 }
 0xb7c   :  { %v1306_v60 = vmul.f32 %v2912_v17, %v1258_v16 }
 0xb7d   :  { %v2914_v13 = vpop.eup %2913 }
 0xb7e   :  { %v1307_v38 = vmul.f32 %v2914_v13, %v1259_v31  ;;  %v2993_v13 = vld [vmem:[%s3922_s3 + $0x10] sm:$0xff] }
 0xb80   :  { %v1311_v25 = vpack.c.bf16 %v1307_v38, %v1306_v60 }
 0xb82   :  { %2657 = vmatmul.mubr.msk.bf16.gmra.mrb[52].mxu1 %vm193_vm1, %v1311_v25 }
 0xb83   :  { %v2916_v20 = vpop.eup %2915  ;;  %2660 = vmatprep.mubr.msk.bf16.mxu1 %vm2998_vm0, %v2997_v0 }
 0xb84   :  { %v1308_v22 = vmul.f32 %v2916_v20, %v1260_v45  ;;  %v2994_v20 = vld [vmem:[%s3922_s3 + $0x18] sm:$0xff] }
 0xb85   :  { %v2918_v21 = vpop.eup %2917 }
 0xb86   :  { %v1309_v12 = vmul.f32 %v2918_v21, %v1261_v46 }
 0xb88   :  { %v1312_v23 = vpack.c.bf16 %v1309_v12, %v1308_v22 }
 0xb8a   :  { %2661 = vmatmul.mubr.msk.bf16.gmra.mrb[56].mxu1 %vm193_vm1, %v1312_v23 }
 0xb8b   :  { %2670 = vmatprep.mubr.msk.bf16.mxu1 %vm2998_vm0, %v2997_v0 }
 0xc4d   :  { %v1381_v6 = vpop.f32.mrb[48].mxu1 }
 0xc4e   :  { %v2654_v26 = vpop.f32.mrb[49].mxu1  ;;  %v1382_v19 = vadd.f32 %v2332_v24, %v1381_v6  ;;  %v2995_v6 = vld [vmem:[%s3922_s3 + $0x20] sm:$0xff] }
 0xc4f   :  { %v1384_v27 = vpop.f32.mrb[50].mxu1 }
 0xc50   :  { %v1385_v16 = vadd.f32 %v2332_v24, %v1384_v27  ;;  %v2655_v54 = vpop.f32.mrb[51].mxu1 }
 0xc52   :  { %v3575_v31 = vpack.c.bf16 %v1385_v16, %v1382_v19  ;;  %v2996_v16 = vld [vmem:[%s3922_s3 + $0x28] sm:$0xff] }
 0xc54   :  { %1410 = vrot.lane.b32.xlu1 %v3575_v31, %s2999_s30 }
 0xc55   :  { %v1389_v33 = vpop.f32.mrb[52].mxu1 }
 0xc56   :  { %v2658_v34 = vpop.f32.mrb[53].mxu1  ;;  %v1390_v39 = vadd.f32 %v2332_v24, %v1389_v33 }
 0xc57   :  { %v1392_v37 = vpop.f32.mrb[54].mxu1 }
 0xc58   :  { %v1393_v40 = vadd.f32 %v2332_v24, %v1392_v37  ;;  %v2659_v29 = vpop.f32.mrb[55].mxu1 }
 0xc5a   :  { %v3579_v41 = vpack.c.bf16 %v1393_v40, %v1390_v39 }
 0xc5c   :  { %1412 = vrot.lane.b32.xlu0 %v3579_v41, %s2999_s30 }
 0xc5d   :  { %v1397_v45 = vpop.f32.mrb[56].mxu1 }
 0xc5e   :  { %v2662_v43 = vpop.f32.mrb[57].mxu1  ;;  %v1398_v30 = vadd.f32 %v2332_v24, %v1397_v45 }
 0xc5f   :  { %v1400_v46 = vpop.f32.mrb[58].mxu1 }
 0xc60   :  { %v1401_v63 = vadd.f32 %v2332_v24, %v1400_v46  ;;  %v2663_v36 = vpop.f32.mrb[59].mxu1 }
 0xc62   :  { %v3583_v48 = vpack.c.bf16 %v1401_v63, %v1398_v30 }
 0xc64   :  { %1645 = vrot.lane.b32.xlu0 %v3583_v48, %s3000_s11  ;;  %1414 = vrot.lane.b32.xlu1 %v3583_v48, %s2999_s30 }
 0xc68   :  { %1637 = vrot.lane.b32.xlu0 %v3579_v41, %s3001_s12  ;;  %1641 = vrot.lane.b32.xlu1 %v3575_v31, %s3000_s11 }
 0xc6c   :  { %1643 = vrot.lane.b32.xlu1 %v3579_v41, %s3000_s11 }
 0xc70   :  { %1635 = vrot.lane.b32.xlu1 %v3575_v31, %s3001_s12 }
 0xc74   :  { %1639 = vrot.lane.b32.xlu1 %v3583_v48, %s3001_s12 }
 0xcc6   :  { %v1411_v49 = vpop.permute.xlu1 %1410 }
 0xcc7   :  { %v1426_v1 = vsel %vm377_vm2, %v1411_v49, 0 }
 0xcc8   :  { %2665 = vmatpush3.bf16.xpose.msra.mxu1 %v1426_v1 }
 0xcc9   :  { %2666 = vmatprep.subr.bf16.mxu1 %v2997_v0 }
 0xcce   :  { %v1413_v32 = vpop.permute.xlu0 %1412 }
 0xccf   :  { %v1429_v8 = vsel %vm377_vm2, %v1413_v32, 0 }
 0xcd0   :  { %2667 = vmatpush3.bf16.xpose.msra.mxu1 %v1429_v8 }
 0xcd1   :  { %2668 = vmatprep.subr.bf16.mxu1 %v2997_v0 }
 0xcd6   :  { %v1415_v50 = vpop.permute.xlu1 %1414  ;;  %v1646_v58 = vpop.permute.xlu0 %1645 }
 0xcd7   :  { %v1432_v47 = vsel %vm377_vm2, %v1415_v50, 0  ;;  %v1663_v62 = vsel %vm377_vm2, %v1646_v58, 0 }
 0xcd8   :  { %2669 = vmatpush3.bf16.xpose.msra.mxu1 %v1432_v47 }
 0xcd9   :  { %2700 = vmatprep.subr.bf16.mxu1 %v2997_v0 }
 0xcda   :  { %v1642_v52 = vpop.permute.xlu1 %1641  ;;  %v1638_v2 = vpop.permute.xlu0 %1637 }
 0xcdb   :  { %v1657_v42 = vsel %vm377_vm2, %v1642_v52, 0 }
 0xcde   :  { %v1644_v44 = vpop.permute.xlu1 %1643 }
 0xcdf   :  { %2671 = vmatmul.mubr.msk.bf16.vlgmr.msra.gmra.mrb[60].mxu1 %vm377_vm2, %v3575_v31  ;;  %v1660_v61 = vsel %vm377_vm2, %v1644_v44, 0 }
 0xce0   :  { %2701 = vmatpush3.bf16.xpose.msra.mxu1 %v1657_v42  ;;  %2674 = vmatprep.mubr.msk.bf16.mxu1 %vm2998_vm0, %v2997_v0 }
 0xce1   :  { %2702 = vmatprep.subr.bf16.mxu1 %v2997_v0 }
 0xce2   :  { %v1636_v55 = vpop.permute.xlu1 %1635 }
 0xce6   :  { %v1640_v3 = vpop.permute.xlu1 %1639 }
 0xce7   :  { %2675 = vmatmul.mubr.msk.bf16.gmra.mrb[64].mxu1 %vm377_vm2, %v3579_v41 }
 0xce8   :  { %2703 = vmatpush3.bf16.xpose.msra.mxu1 %v1660_v61  ;;  %2678 = vmatprep.mubr.msk.bf16.mxu1 %vm2998_vm0, %v2997_v0 }
 0xce9   :  { %2704 = vmatprep.subr.bf16.mxu1 %v2997_v0 }
 0xcef   :  { %2679 = vmatmul.mubr.msk.bf16.gmra.mrb[68].mxu1 %vm377_vm2, %v3583_v48 }
 0xcf0   :  { %2705 = vmatpush3.bf16.xpose.msra.mxu1 %v1663_v62  ;;  %2706 = vmatprep.mubr.msk.bf16.mxu1 %vm2998_vm0, %v2997_v0 }
 0xcf1   :  { %2736 = vmatprep.subr.bf16.mxu1 %v2997_v0 }
 0xcf7   :  { %2707 = vmatmul.mubr.msk.bf16.vlgmr.msra.gmra.mrb[72].mxu1 %vm377_vm2, %v1636_v55 }
 0xcf8   :  { %2710 = vmatprep.mubr.msk.bf16.mxu1 %vm2998_vm0, %v2997_v0 }
 0xcff   :  { %2711 = vmatmul.mubr.msk.bf16.gmra.mrb[76].mxu1 %vm377_vm2, %v1638_v2 }
 0xd00   :  { %2714 = vmatprep.mubr.msk.bf16.mxu1 %vm2998_vm0, %v2997_v0 }
 0xd07   :  { %2715 = vmatmul.mubr.msk.bf16.gmra.mrb[80].mxu1 %vm377_vm2, %v1640_v3 }
 0xd08   :  { %2740 = vmatprep.mubr.msk.bf16.mxu1 %vm2998_vm0, %v2997_v0 }
 0xdb2   :  { %v1468_v59 = vpop.f32.mrb[60].mxu1 }
 0xdb3   :  { %v3635_v9 = vadd.f32 %v2991_v5, %v1468_v59  ;;  %v2672_v10 = vpop.f32.mrb[61].mxu1 }
 0xdb4   :  { %v1471_v11 = vpop.f32.mrb[62].mxu1 }
 0xdb5   :  { %v3640_v28 = vadd.f32 %v2992_v15, %v1471_v11  ;;  %v2673_v51 = vpop.f32.mrb[63].mxu1  ;;  %v1491_v18 = vsel %vm453_vm3, %v3635_v9, -inf }
 0xdb6   :  { %1492 = vmax.xlane.f32.xlu0 %v1491_v18 }
 0xdb7   :  { %v1494_v14 = vsel %vm453_vm3, %v3640_v28, -inf }
 0xdb8   :  { %1495 = vmax.xlane.f32.xlu1 %v1494_v14 }
 0xdba   :  { %v1476_v17 = vpop.f32.mrb[64].mxu1 }
 0xdbb   :  { %v3649_v60 = vadd.f32 %v2993_v13, %v1476_v17  ;;  %v2676_v38 = vpop.f32.mrb[65].mxu1 }
 0xdbc   :  { %v1479_v25 = vpop.f32.mrb[66].mxu1 }
 0xdbd   :  { %v1480_v21 = vadd.f32 %v2994_v20, %v1479_v25  ;;  %v2677_v22 = vpop.f32.mrb[67].mxu1  ;;  %v1497_v12 = vsel %vm453_vm3, %v3649_v60, -inf }
 0xdbe   :  { %1498 = vmax.xlane.f32.xlu0 %v1497_v12 }
 0xdbf   :  { %v1500_v23 = vsel %vm453_vm3, %v1480_v21, -inf }
 0xdc2   :  { %1501 = vmax.xlane.f32.xlu0 %v1500_v23  ;;  %v1484_v24 = vpop.f32.mrb[68].mxu1 }
 0xdc3   :  { %v3660_v26 = vadd.f32 %v2995_v6, %v1484_v24  ;;  %v2680_v27 = vpop.f32.mrb[69].mxu1 }
 0xdc4   :  { %v1487_v19 = vpop.f32.mrb[70].mxu1 }
 0xdc5   :  { %v1488_v54 = vadd.f32 %v2996_v16, %v1487_v19  ;;  %v2681_v33 = vpop.f32.mrb[71].mxu1  ;;  %v1503_v34 = vsel %vm453_vm3, %v3660_v26, -inf }
 0xdc6   :  { %1504 = vmax.xlane.f32.xlu0 %v1503_v34 }
 0xdc7   :  { %v1506_v37 = vsel %vm453_vm3, %v1488_v54, -inf }
 0xdc8   :  { %1507 = vmax.xlane.f32.xlu1 %v1506_v37 }
 0xdca   :  { %v1699_v39 = vpop.f32.mrb[72].mxu1 }
 0xdcb   :  { %v1700_v40 = vadd.f32 %v2991_v5, %v1699_v39  ;;  %v2708_v29 = vpop.f32.mrb[73].mxu1 }
 0xdcc   :  { %v1702_v45 = vpop.f32.mrb[74].mxu1 }
 0xdcd   :  { %v3668_v43 = vadd.f32 %v2992_v15, %v1702_v45  ;;  %v2709_v46 = vpop.f32.mrb[75].mxu1  ;;  %v1722_v30 = vsel %vm453_vm3, %v1700_v40, -inf }
 0xdce   :  { %1723 = vmax.xlane.f32.xlu0 %v1722_v30 }
 0xdcf   :  { %v1725_v63 = vsel %vm453_vm3, %v3668_v43, -inf }
 0xdd0   :  { %1726 = vmax.xlane.f32.xlu1 %v1725_v63 }
 0xdd2   :  { %v1707_v36 = vpop.f32.mrb[76].mxu1 }
 0xdd3   :  { %v1708_v49 = vadd.f32 %v2993_v13, %v1707_v36  ;;  %v2712_v1 = vpop.f32.mrb[77].mxu1 }
 0xdd4   :  { %v1710_v32 = vpop.f32.mrb[78].mxu1 }
 0xdd5   :  { %v1711_v8 = vadd.f32 %v2994_v20, %v1710_v32  ;;  %v2713_v50 = vpop.f32.mrb[79].mxu1  ;;  %v1728_v47 = vsel %vm453_vm3, %v1708_v49, -inf }
 0xdd6   :  { %1729 = vmax.xlane.f32.xlu0 %v1728_v47 }
 0xdd7   :  { %v1731_v52 = vsel %vm453_vm3, %v1711_v8, -inf }
 0xdd8   :  { %1732 = vmax.xlane.f32.xlu1 %v1731_v52 }
 0xdda   :  { %v1715_v42 = vpop.f32.mrb[80].mxu1 }
 0xddb   :  { %v2716_v44 = vpop.f32.mrb[81].mxu1  ;;  %v3683_v2 = vadd.f32 %v2995_v6, %v1715_v42 }
 0xddc   :  { %v1718_v61 = vpop.f32.mrb[82].mxu1 }
 0xddd   :  { %v3675_v58 = vadd.f32 %v2996_v16, %v1718_v61  ;;  %v2717_v62 = vpop.f32.mrb[83].mxu1  ;;  %v1734_v3 = vsel %vm453_vm3, %v3683_v2, -inf }
 0xddf   :  { %v1737_v55 = vsel %vm453_vm3, %v3675_v58, -inf }
 0xde0   :  { %1738 = vmax.xlane.f32.xlu1 %v1737_v55 }
 0xdec   :  { %1560 = vrot.lane.b32.xlu0 %v3575_v31, %s3002_s1 }
 0xdf1   :  { %1562 = vrot.lane.b32.xlu1 %v3579_v41, %s3002_s1 }
 0xe0b   :  { %1735 = vmax.xlane.f32.xlu0 %v1734_v3 }
 0xe43   :  { %v1493_v59 = vpop.xlane.xlu0 %1492 }
 0xe44   :  { %v1509_v5 = vsub.f32 %v3635_v9, %v1493_v59 }
 0xe45   :  { %v1496_v10 = vpop.xlane.xlu1 %1495 }
 0xe46   :  { %v1515_v11 = vmul.f32 1.442695, %v1509_v5  ;;  %v1510_v15 = vsub.f32 %v3640_v28, %v1496_v10 }
 0xe48   :  { %2919 = vpow2.f32 %v1515_v11  ;;  %v1517_v51 = vmul.f32 1.442695, %v1510_v15 }
 0xe4a   :  { %2921 = vpow2.f32 %v1517_v51 }
 0xe4b   :  { %v1499_v18 = vpop.xlane.xlu0 %1498 }
 0xe4c   :  { %v1511_v32 = vsub.f32 %v3649_v60, %v1499_v18 }
 0xe4e   :  { %v1519_v47 = vmul.f32 1.442695, %v1511_v32 }
 0xe4f   :  { %v1502_v14 = vpop.xlane.xlu0 %1501 }
 0xe50   :  { %v1512_v17 = vsub.f32 %v1480_v21, %v1502_v14 }
 0xe52   :  { %v3689_v13 = vpop.eup %2919  ;;  %v1521_v38 = vmul.f32 1.442695, %v1512_v17 }
 0xe53   :  { %v1527_v25 = vsel %vm453_vm3, %v3689_v13, 0.0  ;;  %v1505_v12 = vpop.xlane.xlu0 %1504 }
 0xe54   :  { %v3693_v20 = vpop.eup %2921  ;;  %2923 = vpow2.f32 %v1521_v38  ;;  %1528 = vadd.xlane.f32.xlu0 %v1527_v25  ;;  %v1513_v52 = vsub.f32 %v3660_v26, %v1505_v12 }
 0xe55   :  { %v1508_v9 = vpop.xlane.xlu1 %1507  ;;  %v1530_v28 = vsel %vm453_vm3, %v3693_v20, 0.0 }
 0xe56   :  { %v1514_v22 = vsub.f32 %v1488_v54, %v1508_v9  ;;  %1531 = vadd.xlane.f32.xlu1 %v1530_v28  ;;  %v1523_v44 = vmul.f32 1.442695, %v1513_v52 }
 0xe58   :  { %v1525_v23 = vmul.f32 1.442695, %v1514_v22 }
 0xe5a   :  { %2925 = vpow2.f32 %v1525_v23 }
 0xe5b   :  { %v1724_v21 = vpop.xlane.xlu0 %1723 }
 0xe5c   :  { %v1740_v24 = vsub.f32 %v1700_v40, %v1724_v21 }
 0xe5d   :  { %v1727_v16 = vpop.xlane.xlu1 %1726 }
 0xe5e   :  { %v3697_v6 = vpop.eup %2923  ;;  %v1746_v27 = vmul.f32 1.442695, %v1740_v24  ;;  %v1741_v61 = vsub.f32 %v3668_v43, %v1727_v16 }
 0xe5f   :  { %v1536_v19 = vsel %vm453_vm3, %v3697_v6, 0.0 }
 0xe60   :  { %2927 = vpow2.f32 %v1746_v27  ;;  %1537 = vadd.xlane.f32.xlu1 %v1536_v19  ;;  %v1748_v60 = vmul.f32 1.442695, %v1741_v61 }
 0xe63   :  { %v1730_v33 = vpop.xlane.xlu0 %1729 }
 0xe64   :  { %v3701_v34 = vpop.eup %2925  ;;  %v1742_v37 = vsub.f32 %v1708_v49, %v1730_v33 }
 0xe65   :  { %v1733_v54 = vpop.xlane.xlu1 %1732  ;;  %v1542_v39 = vsel %vm453_vm3, %v3701_v34, 0.0 }
 0xe66   :  { %v1750_v29 = vmul.f32 1.442695, %v1742_v37  ;;  %v1743_v45 = vsub.f32 %v1711_v8, %v1733_v54  ;;  %1543 = vadd.xlane.f32.xlu1 %v1542_v39 }
 0xe67   :  { %v1561_v40 = vpop.permute.xlu0 %1560 }
 0xe68   :  { %2929 = vpow2.f32 %v1750_v29  ;;  %v1752_v46 = vmul.f32 1.442695, %v1743_v45  ;;  %2683 = vmatpush3.bf16.msra.mxu0 %v1561_v40 }
 0xe69   :  { %2684 = vmatprep.subr.bf16.mxu0 %v2997_v0 }
 0xe6a   :  { %v3706_v30 = vpop.eup %2927  ;;  %2931 = vpow2.f32 %v1752_v46  ;;  %1564 = vrot.lane.b32.xlu0 %v3583_v48, %s3002_s1 }
 0xe6b   :  { %v1758_v63 = vsel %vm453_vm3, %v3706_v30, 0.0  ;;  %2933 = vpow2.f32 %v1519_v47 }
 0xe6c   :  { %1759 = vadd.xlane.f32.xlu1 %v1758_v63  ;;  %2935 = vpow2.f32 %v1523_v44 }
 0xe6d   :  { %v1739_v36 = vpop.xlane.xlu1 %1738  ;;  %2937 = vpow2.f32 %v1748_v60 }
 0xe6e   :  { %v1745_v10 = vsub.f32 %v3675_v58, %v1739_v36 }
 0xe70   :  { %v1756_v15 = vmul.f32 1.442695, %v1745_v10 }
 0xe71   :  { %v1563_v49 = vpop.permute.xlu1 %1562 }
 0xe72   :  { %v3712_v1 = vpop.eup %2929  ;;  %2685 = vmatpush3.bf16.msra.mxu0 %v1563_v49 }
 0xe73   :  { %v1764_v8 = vsel %vm453_vm3, %v3712_v1, 0.0  ;;  %2686 = vmatprep.subr.bf16.mxu0 %v2997_v0 }
 0xe74   :  { %v3718_v50 = vpop.eup %2931  ;;  %1765 = vadd.xlane.f32.xlu1 %v1764_v8 }
 0xe75   :  { %v1767_v42 = vsel %vm453_vm3, %v3718_v50, 0.0  ;;  %v2934_v62 = vpop.eup %2933 }
 0xe76   :  { %v1533_v55 = vsel %vm453_vm3, %v2934_v62, 0.0  ;;  %v2936_v3 = vpop.eup %2935 }
 0xe77   :  { %v1539_v59 = vsel %vm453_vm3, %v2936_v3, 0.0  ;;  %v3726_v5 = vpop.eup %2937 }
 0xe78   :  { %1768 = vadd.xlane.f32.xlu1 %v1767_v42  ;;  %v1761_v26 = vsel %vm453_vm3, %v3726_v5, 0.0 }
 0xe89   :  { %1534 = vadd.xlane.f32.xlu0 %v1533_v55 }
 0xe8d   :  { %1540 = vadd.xlane.f32.xlu0 %v1539_v59 }
 0xe91   :  { %1762 = vadd.xlane.f32.xlu0 %v1761_v26 }
 0xe98   :  { %v1736_v43 = vpop.xlane.xlu0 %1735 }
 0xe99   :  { %v1744_v11 = vsub.f32 %v3683_v2, %v1736_v43 }
 0xe9b   :  { %v1754_v51 = vmul.f32 1.442695, %v1744_v11 }
 0xe9d   :  { %2939 = vpow2.f32 %v1754_v51 }
 0xe9e   :  { %2941 = vpow2.f32 %v1756_v15 }
 0xea7   :  { %v3732_v18 = vpop.eup %2939  ;;  %1793 = vrot.lane.b32.xlu0 %v3579_v41, %s3003_s24 }
 0xea8   :  { %v1770_v14 = vsel %vm453_vm3, %v3732_v18, 0.0  ;;  %v3738_v17 = vpop.eup %2941 }
 0xea9   :  { %1771 = vadd.xlane.f32.xlu1 %v1770_v14  ;;  %v1773_v58 = vsel %vm453_vm3, %v3738_v17, 0.0 }
 0xeab   :  { %1795 = vrot.lane.b32.xlu0 %v3583_v48, %s3003_s24 }
 0xead   :  { %1774 = vadd.xlane.f32.xlu1 %v1773_v58 }
 0xebe   :  { %1791 = vrot.lane.b32.xlu1 %v3575_v31, %s3003_s24 }
 0xee1   :  { %v1529_v2 = vpop.xlane.xlu0 %1528 }
 0xee2   :  { %2943 = vrcp.f32 %v1529_v2 }
 0xee3   :  { %v1532_v38 = vpop.xlane.xlu1 %1531 }
 0xee4   :  { %2945 = vrcp.f32 %v1532_v38 }
 0xee5   :  { %v1565_v41 = vpop.permute.xlu0 %1564 }
 0xee6   :  { %2687 = vmatpush3.bf16.msra.mxu0 %v1565_v41 }
 0xee7   :  { %2718 = vmatprep.subr.bf16.mxu0 %v2997_v0 }
 0xeec   :  { %v2944_v25 = vpop.eup %2943 }
 0xeed   :  { %v1551_v28 = vmul.f32 %v2944_v25, %v3689_v13  ;;  %v1538_v31 = vpop.xlane.xlu1 %1537 }
 0xeee   :  { %v2946_v9 = vpop.eup %2945  ;;  %2947 = vrcp.f32 %v1538_v31 }
 0xeef   :  { %v1552_v48 = vmul.f32 %v2946_v9, %v3693_v20 }
 0xef1   :  { %v1557_v22 = vpack.c.bf16 %v1552_v48, %v1551_v28 }
 0xef3   :  { %2689 = vmatmul.mubr.msk.bf16.vlgmr.msra.gmra.mrb[48].mxu0 %vm453_vm3, %v1557_v22  ;;  %v1544_v23 = vpop.xlane.xlu1 %1543 }
 0xef4   :  { %2692 = vmatprep.mubr.msk.bf16.mxu0 %vm2998_vm0, %v2997_v0 }
 0xef8   :  { %v2948_v24 = vpop.eup %2947 }
 0xef9   :  { %v1554_v13 = vmul.f32 %v2948_v24, %v3697_v6  ;;  %v1760_v37 = vpop.xlane.xlu1 %1759 }
 0xf01   :  { %v1766_v29 = vpop.xlane.xlu1 %1765 }
 0xf05   :  { %v1769_v6 = vpop.xlane.xlu1 %1768 }
 0xf16   :  { %v1535_v12 = vpop.xlane.xlu0 %1534 }
 0xf17   :  { %2949 = vrcp.f32 %v1535_v12 }
 0xf1a   :  { %v1541_v21 = vpop.xlane.xlu0 %1540 }
 0xf1b   :  { %2951 = vrcp.f32 %v1541_v21 }
 0xf1c   :  { %2953 = vrcp.f32 %v1544_v23 }
 0xf1e   :  { %v1763_v40 = vpop.xlane.xlu0 %1762 }
 0xf1f   :  { %2955 = vrcp.f32 %v1763_v40 }
 0xf20   :  { %2957 = vrcp.f32 %v1760_v37 }
 0xf21   :  { %v2950_v27 = vpop.eup %2949  ;;  %2959 = vrcp.f32 %v1769_v6 }
 0xf22   :  { %v1553_v19 = vmul.f32 %v2950_v27, %v2934_v62  ;;  %v1794_v49 = vpop.permute.xlu0 %1793  ;;  %2961 = vrcp.f32 %v1766_v29 }
 0xf24   :  { %v1558_v20 = vpack.c.bf16 %v1554_v13, %v1553_v19 }
 0xf25   :  { %v2952_v16 = vpop.eup %2951 }
 0xf26   :  { %2693 = vmatmul.mubr.msk.bf16.gmra.mrb[52].mxu0 %vm453_vm3, %v1558_v20  ;;  %v2954_v33 = vpop.eup %2953  ;;  %v1555_v54 = vmul.f32 %v2952_v16, %v2936_v3  ;;  %v1796_v52 = vpop.permute.xlu0 %1795 }
 0xf27   :  { %2696 = vmatprep.mubr.msk.bf16.mxu0 %vm2998_vm0, %v2997_v0  ;;  %v1556_v39 = vmul.f32 %v2954_v33, %v3701_v34 }
 0xf29   :  { %v1559_v45 = vpack.c.bf16 %v1556_v39, %v1555_v54  ;;  %v2956_v34 = vpop.eup %2955 }
 0xf2a   :  { %v2958_v32 = vpop.eup %2957  ;;  %v1783_v8 = vmul.f32 %v2956_v34, %v3726_v5 }
 0xf2b   :  { %v1782_v47 = vmul.f32 %v2958_v32, %v3706_v30  ;;  %v2960_v44 = vpop.eup %2959 }
 0xf2c   :  { %v2962_v61 = vpop.eup %2961  ;;  %v1785_v60 = vmul.f32 %v2960_v44, %v3718_v50 }
 0xf2d   :  { %v1788_v42 = vpack.c.bf16 %v1783_v8, %v1782_v47  ;;  %v1784_v62 = vmul.f32 %v2962_v61, %v3712_v1 }
 0xf2e   :  { %2697 = vmatmul.mubr.msk.bf16.gmra.mrb[56].mxu0 %vm453_vm3, %v1559_v45 }
 0xf2f   :  { %2724 = vmatprep.mubr.msk.bf16.mxu0 %vm2998_vm0, %v2997_v0  ;;  %v1789_v55 = vpack.c.bf16 %v1785_v60, %v1784_v62 }
 0xf36   :  { %v1772_v46 = vpop.xlane.xlu1 %1771 }
 0xf3a   :  { %v1775_v63 = vpop.xlane.xlu1 %1774 }
 0xf3b   :  { %2963 = vrcp.f32 %v1775_v63 }
 0xf3c   :  { %2965 = vrcp.f32 %v1772_v46 }
 0xf3e   :  { %v1792_v36 = vpop.permute.xlu1 %1791 }
 0xf3f   :  { %2719 = vmatpush3.bf16.msra.mxu0 %v1792_v36 }
 0xf40   :  { %2720 = vmatprep.subr.bf16.mxu0 %v2997_v0 }
 0xf43   :  { %2721 = vmatpush3.bf16.msra.mxu0 %v1794_v49 }
 0xf44   :  { %2722 = vmatprep.subr.bf16.mxu0 %v2997_v0 }
 0xf45   :  { %v2964_v30 = vpop.eup %2963 }
 0xf46   :  { %v2966_v3 = vpop.eup %2965  ;;  %v1787_v59 = vmul.f32 %v2964_v30, %v3738_v17 }
 0xf47   :  { %2723 = vmatpush3.bf16.msra.mxu0 %v1796_v52  ;;  %v1786_v5 = vmul.f32 %v2966_v3, %v3732_v18 }
 0xf48   :  { %2752 = vmatprep.subr.bf16.mxu0 %v2997_v0 }
 0xf49   :  { %v1790_v26 = vpack.c.bf16 %v1787_v59, %v1786_v5 }
 0xf4a   :  { %2725 = vmatmul.mubr.msk.bf16.vlgmr.msra.gmra.mrb[60].mxu0 %vm453_vm3, %v1788_v42 }
 0xf4b   :  { %2728 = vmatprep.mubr.msk.bf16.mxu0 %vm2998_vm0, %v2997_v0 }
 0xf52   :  { %2729 = vmatmul.mubr.msk.bf16.gmra.mrb[64].mxu0 %vm453_vm3, %v1789_v55 }
 0xf53   :  { %2732 = vmatprep.mubr.msk.bf16.mxu0 %vm2998_vm0, %v2997_v0 }
 0xf5a   :  { %2733 = vmatmul.mubr.msk.bf16.gmra.mrb[68].mxu0 %vm453_vm3, %v1790_v26 }
 0xf5b   :  { %2768 = vmatprep.mubr.msk.bf16.mxu0 %vm2998_vm0, %v2997_v0 }
 0xfc6   :  { %v1612_v50 = vpop.f32.mrb[48].mxu0 }
 0xfc7   :  { %v2690_v1 = vpop.f32.mrb[49].mxu0 }
 0xfc8   :  { %v1615_v10 = vpop.f32.mrb[50].mxu0 }
 0xfc9   :  { %v2691_v43 = vpop.f32.mrb[51].mxu0 }
 0xff9   :  { %v1620_v11 = vpop.f32.mrb[52].mxu0 }
 0xffa   :  { %v2694_v15 = vpop.f32.mrb[53].mxu0 }
 0xffb   :  { %v1623_v51 = vpop.f32.mrb[54].mxu0 }
 0xffc   :  { %v2695_v14 = vpop.f32.mrb[55].mxu0 }
0x1001   :  { %v1628_v58 = vpop.f32.mrb[56].mxu0 }
0x1002   :  { %v2698_v2 = vpop.f32.mrb[57].mxu0 }
0x1003   :  { %v1631_v38 = vpop.f32.mrb[58].mxu0 }
0x1004   :  { %v2699_v17 = vpop.f32.mrb[59].mxu0 }
0x101d   :  { %v1843_v41 = vpop.f32.mrb[60].mxu0 }
0x101e   :  { %1872 = vrot.lane.b32.xlu0 %v1843_v41, %s3004_s2  ;;  %v2726_v18 = vpop.f32.mrb[61].mxu0 }
0x101f   :  { %v1846_v25 = vpop.f32.mrb[62].mxu0 }
0x1020   :  { %1874 = vrot.lane.b32.xlu1 %v1846_v25, %s3004_s2  ;;  %v2727_v9 = vpop.f32.mrb[63].mxu0 }
0x1021   :  { %v2813_v9 = vld [vmem:[%s3923_s6 + $0x10] sm:$0xff]  }
0x1022   :  { %2737 = vmatpush3.bf16.msra.mxu1 %v2813_v9 }
0x1023   :  { %2738 = vmatprep.subr.bf16.mxu1 %v2997_v0 }
0x1025   :  { %v1851_v28 = vpop.f32.mrb[64].mxu0 }
0x1026   :  { %1876 = vrot.lane.b32.xlu0 %v1851_v28, %s3004_s2  ;;  %v2730_v48 = vpop.f32.mrb[65].mxu0  ;;  %v2814_v28 = vld [vmem:[%s3923_s6 + $0x18] sm:$0xff]  }
0x1027   :  { %v1854_v22 = vpop.f32.mrb[66].mxu0  ;;  %2739 = vmatpush3.bf16.msra.mxu1 %v2814_v28 }
0x1028   :  { %1878 = vrot.lane.b32.xlu1 %v1854_v22, %s3004_s2  ;;  %v2731_v31 = vpop.f32.mrb[67].mxu0 }
0x102d   :  { %v1859_v12 = vpop.f32.mrb[68].mxu0 }
0x102e   :  { %1880 = vrot.lane.b32.xlu0 %v1859_v12, %s3004_s2  ;;  %v2734_v23 = vpop.f32.mrb[69].mxu0 }
0x102f   :  { %v1862_v21 = vpop.f32.mrb[70].mxu0 }
0x1030   :  { %1882 = vrot.lane.b32.xlu1 %v1862_v21, %s3004_s2  ;;  %v2735_v24 = vpop.f32.mrb[71].mxu0 }
0x1090   :  { %v1873_v27 = vpop.permute.xlu0 %1872 }
0x1091   :  { %v1890_v19 = vsel %vm377_vm2, %v1612_v50, %v1873_v27 }
0x1092   :  { %v3786_v13 = vadd.f32 %v1890_v19, %v3514_v53  ;;  %v1875_v20 = vpop.permute.xlu1 %1874 }
0x1093   :  { %v1891_v16 = vsel %vm377_vm2, %v1615_v10, %v1875_v20 }
0x1094   :  { %v3790_v33 = vadd.f32 %v1891_v16, %v3517_v56  ;;  %v1902_v37 = vsel %vm193_vm1, %v3786_v13, 0.0 }
0x1095   :  { %1903 = vadd.xlane.f32.xlu0 %v1902_v37 }
0x1096   :  { %v1905_v54 = vsel %vm193_vm1, %v3790_v33, 0.0 }
0x1097   :  { %1906 = vadd.xlane.f32.xlu1 %v1905_v54 }
0x1098   :  { %v1877_v39 = vpop.permute.xlu0 %1876 }
0x1099   :  { %v1892_v29 = vsel %vm377_vm2, %v1620_v11, %v1877_v39 }
0x109a   :  { %v3798_v53 = vadd.f32 %v1892_v29, %v3524_v4  ;;  %v1879_v45 = vpop.permute.xlu1 %1878 }
0x109b   :  { %v1893_v6 = vsel %vm377_vm2, %v1623_v51, %v1879_v45 }
0x109c   :  { %v3802_v56 = vadd.f32 %v1893_v6, %v3527_v7  ;;  %v1908_v40 = vsel %vm193_vm1, %v3798_v53, 0.0 }
0x109d   :  { %1909 = vadd.xlane.f32.xlu0 %v1908_v40 }
0x109e   :  { %v1911_v63 = vsel %vm193_vm1, %v3802_v56, 0.0 }
0x10a0   :  { %v1881_v46 = vpop.permute.xlu0 %1880 }
0x10a1   :  { %v1894_v36 = vsel %vm377_vm2, %v1628_v58, %v1881_v46  ;;  %1912 = vadd.xlane.f32.xlu0 %v1911_v63 }
0x10a2   :  { %v3810_v4 = vadd.f32 %v1894_v36, %v3534_v57  ;;  %v1883_v49 = vpop.permute.xlu1 %1882 }
0x10a3   :  { %v1895_v34 = vsel %vm377_vm2, %v1631_v38, %v1883_v49 }
0x10a4   :  { %v3814_v7 = vadd.f32 %v1895_v34, %v3537_v35  ;;  %v1914_v32 = vsel %vm193_vm1, %v3810_v4, 0.0 }
0x10a5   :  { %1915 = vadd.xlane.f32.xlu0 %v1914_v32 }
0x10a6   :  { %v1917_v8 = vsel %vm193_vm1, %v3814_v7, 0.0 }
0x10a7   :  { %1918 = vadd.xlane.f32.xlu1 %v1917_v8 }
0x1122   :  { %v1904_v47 = vpop.xlane.xlu0 %1903 }
0x1123   :  { %v1920_v52 = vmul.f32 0.03125, %v1904_v47 }
0x1124   :  { %v1907_v42 = vpop.xlane.xlu1 %1906 }
0x1125   :  { %v1926_v57 = vsub.f32 %v3786_v13, %v1920_v52  ;;  %v1921_v44 = vmul.f32 0.03125, %v1907_v42 }
0x1127   :  { %v1927_v61 = vsub.f32 %v3790_v33, %v1921_v44  ;;  %v1932_v60 = vmul.f32 %v1926_v57, %v1926_v57 }
0x1129   :  { %v1938_v35 = vsel %vm193_vm1, %v1932_v60, 0.0  ;;  %v1933_v62 = vmul.f32 %v1927_v61, %v1927_v61 }
0x112a   :  { %1939 = vadd.xlane.f32.xlu0 %v1938_v35  ;;  %v1910_v55 = vpop.xlane.xlu0 %1909 }
0x112b   :  { %v1922_v30 = vmul.f32 0.03125, %v1910_v55  ;;  %v1941_v3 = vsel %vm193_vm1, %v1933_v62, 0.0  ;;  %v2815_v62 = vld [vmem:[%s3924_s8 + $0x40] sm:$0xff]   ;;  %v2816_v55 = vld [vmem:[%s3924_s8 + $0x48] sm:$0xff]  }
0x112c   :  { %1942 = vadd.xlane.f32.xlu1 %v1941_v3  ;;  %2753 = vmatpush3.bf16.msra.mxu0 %v2815_v62  ;;  %v2818_v3 = vld [vmem:[%s3924_s8 + $0x58] sm:$0xff]  }
0x112d   :  { %v1928_v59 = vsub.f32 %v3798_v53, %v1922_v30  ;;  %2754 = vmatprep.subr.bf16.mxu0 %v2997_v0  ;;  %v2817_v30 = vld [vmem:[%s3924_s8 + $0x50] sm:$0xff]  }
0x112e   :  { %v1913_v5 = vpop.xlane.xlu0 %1912 }
0x112f   :  { %v1923_v26 = vmul.f32 0.03125, %v1913_v5  ;;  %v1934_v50 = vmul.f32 %v1928_v59, %v1928_v59  ;;  %v2820_v5 = vld [vmem:[%s3924_s8 + $0x68] sm:$0xff]  }
0x1130   :  { %2755 = vmatpush3.bf16.msra.mxu0 %v2816_v55 }
0x1131   :  { %v1929_v1 = vsub.f32 %v3802_v56, %v1923_v26  ;;  %v1944_v10 = vsel %vm193_vm1, %v1934_v50, 0.0  ;;  %2756 = vmatprep.subr.bf16.mxu0 %v2997_v0  ;;  %v2821_v26 = vld [vmem:[%s3924_s8 + $0x70] sm:$0xff]   ;;  %v2822_v50 = vld [vmem:[%s3924_s8 + $0x78] sm:$0xff]  }
0x1132   :  { %1945 = vadd.xlane.f32.xlu0 %v1944_v10  ;;  %v1916_v43 = vpop.xlane.xlu0 %1915 }
0x1133   :  { %v1924_v11 = vmul.f32 0.03125, %v1916_v43  ;;  %v1935_v15 = vmul.f32 %v1929_v1, %v1929_v1 }
0x1134   :  { %v1919_v51 = vpop.xlane.xlu1 %1918  ;;  %2757 = vmatpush3.bf16.msra.mxu0 %v2817_v30 }
0x1135   :  { %v1930_v14 = vsub.f32 %v3810_v4, %v1924_v11  ;;  %v1925_v58 = vmul.f32 0.03125, %v1919_v51  ;;  %v1947_v2 = vsel %vm193_vm1, %v1935_v15, 0.0  ;;  %2758 = vmatprep.subr.bf16.mxu0 %v2997_v0 }
0x1136   :  { %1948 = vadd.xlane.f32.xlu1 %v1947_v2 }
0x1137   :  { %v1931_v38 = vsub.f32 %v3814_v7, %v1925_v58  ;;  %v1936_v17 = vmul.f32 %v1930_v14, %v1930_v14 }
0x1138   :  { %2759 = vmatpush3.bf16.msra.mxu0 %v2818_v3 }
0x1139   :  { %v1950_v41 = vsel %vm193_vm1, %v1936_v17, 0.0  ;;  %v1937_v18 = vmul.f32 %v1931_v38, %v1931_v38  ;;  %2760 = vmatprep.subr.bf16.mxu0 %v2997_v0 }
0x113a   :  { %1951 = vadd.xlane.f32.xlu0 %v1950_v41 }
0x113b   :  { %v1953_v25 = vsel %vm193_vm1, %v1937_v18, 0.0 }
0x113c   :  { %1954 = vadd.xlane.f32.xlu1 %v1953_v25 }
0x11b7   :  { %v1940_v48 = vpop.xlane.xlu0 %1939 }
0x11b8   :  { %v1956_v22 = vmul.f32 0.03125, %v1940_v48 }
0x11b9   :  { %v1943_v31 = vpop.xlane.xlu1 %1942 }
0x11ba   :  { %v1962_v12 = vadd.f32 1e-05, %v1956_v22  ;;  %v1957_v23 = vmul.f32 0.03125, %v1943_v31 }
0x11bc   :  { %2967 = vrsqrt.f32 %v1962_v12  ;;  %v1963_v21 = vadd.f32 1e-05, %v1957_v23 }
0x11be   :  { %2969 = vrsqrt.f32 %v1963_v21 }
0x11bf   :  { %v1946_v24 = vpop.xlane.xlu0 %1945 }
0x11c0   :  { %v1958_v27 = vmul.f32 0.03125, %v1946_v24 }
0x11c2   :  { %v1964_v19 = vadd.f32 1e-05, %v1958_v27 }
0x11c3   :  { %v1949_v20 = vpop.xlane.xlu1 %1948 }
0x11c4   :  { %v1959_v16 = vmul.f32 0.03125, %v1949_v20  ;;  %2971 = vrsqrt.f32 %v1964_v19 }
0x11c6   :  { %v2968_v37 = vpop.eup %2967  ;;  %v1965_v54 = vadd.f32 1e-05, %v1959_v16 }
0x11c7   :  { %v1952_v39 = vpop.xlane.xlu0 %1951  ;;  %v1974_v6 = vmul.f32 %v2968_v37, %v1926_v57 }
0x11c8   :  { %v2970_v29 = vpop.eup %2969  ;;  %2973 = vrsqrt.f32 %v1965_v54  ;;  %v1960_v45 = vmul.f32 0.03125, %v1952_v39 }
0x11c9   :  { %v1975_v40 = vmul.f32 %v2970_v29, %v1927_v61  ;;  %v1955_v46 = vpop.xlane.xlu1 %1954 }
0x11ca   :  { %v1966_v63 = vadd.f32 1e-05, %v1960_v45  ;;  %v1961_v36 = vmul.f32 0.03125, %v1955_v46 }
0x11cb   :  { %v1980_v49 = vpack.c.bf16 %v1975_v40, %v1974_v6 }
0x11cc   :  { %v1967_v34 = vadd.f32 1e-05, %v1961_v36  ;;  %2975 = vrsqrt.f32 %v1966_v63 }
0x11cd   :  { %2741 = vmatmul.mubr.msk.bf16.vlgmr.msra.gmra.mrb[84].mxu1 %vm193_vm1, %v1980_v49 }
0x11ce   :  { %2977 = vrsqrt.f32 %v1967_v34  ;;  %2744 = vmatprep.mubr.msk.bf16.mxu1 %vm2998_vm0, %v2997_v0  ;;  %v2972_v32 = vpop.eup %2971 }
0x11cf   :  { %v1976_v47 = vmul.f32 %v2972_v32, %v1928_v59  ;;  %v2819_v59 = vld [vmem:[%s3924_s8 + $0x60] sm:$0xff]  }
0x11d0   :  { %2761 = vmatpush3.bf16.msra.mxu0 %v2819_v59 }
0x11d1   :  { %2762 = vmatprep.subr.bf16.mxu0 %v2997_v0 }
0x11d2   :  { %v2974_v8 = vpop.eup %2973 }
0x11d3   :  { %v1977_v52 = vmul.f32 %v2974_v8, %v1929_v1  ;;  %v2355_v1 = vld [vmem:[%s3925_s7 + $0x1] ss:$0 sm:$0xff] }
0x11d4   :  { %2763 = vmatpush3.bf16.msra.mxu0 %v2820_v5 }
0x11d5   :  { %v1981_v42 = vpack.c.bf16 %v1977_v52, %v1976_v47  ;;  %2764 = vmatprep.subr.bf16.mxu0 %v2997_v0 }
0x11d6   :  { %v2976_v44 = vpop.eup %2975 }
0x11d7   :  { %2745 = vmatmul.mubr.msk.bf16.gmra.mrb[88].mxu1 %vm193_vm1, %v1981_v42  ;;  %v1978_v60 = vmul.f32 %v2976_v44, %v1930_v14 }
0x11d8   :  { %v2978_v57 = vpop.eup %2977  ;;  %2748 = vmatprep.mubr.msk.bf16.mxu1 %vm2998_vm0, %v2997_v0  ;;  %2765 = vmatpush3.bf16.msra.mxu0 %v2821_v26 }
0x11d9   :  { %v1979_v61 = vmul.f32 %v2978_v57, %v1931_v38  ;;  %2766 = vmatprep.subr.bf16.mxu0 %v2997_v0 }
0x11db   :  { %v1982_v35 = vpack.c.bf16 %v1979_v61, %v1978_v60 }
0x11dc   :  { %2767 = vmatpush3.bf16.msra.mxu0 %v2822_v50 }
0x11df   :  { %2749 = vmatmul.mubr.msk.bf16.gmra.mrb[92].mxu1 %vm193_vm1, %v1982_v35 }
0x12a0   :  { %v2051_v10 = vpop.f32.mrb[84].mxu1 }
0x12a1   :  { %v2052_v43 = vadd.f32 %v2355_v1, %v2051_v10  ;;  %v2742_v11 = vpop.f32.mrb[85].mxu1 }
0x12a2   :  { %v2054_v15 = vpop.f32.mrb[86].mxu1 }
0x12a3   :  { %v2074_v51 = vmul.f32 %v2052_v43, %v2052_v43  ;;  %v2055_v14 = vadd.f32 %v2355_v1, %v2054_v15  ;;  %v2743_v58 = vpop.f32.mrb[87].mxu1 }
0x12a5   :  { %v2080_v2 = vmul.f32 %v2074_v51, %v2052_v43  ;;  %v2075_v38 = vmul.f32 %v2055_v14, %v2055_v14 }
0x12a7   :  { %v2086_v17 = vmul.f32 0.044715, %v2080_v2  ;;  %v2081_v41 = vmul.f32 %v2075_v38, %v2055_v14 }
0x12a9   :  { %v2092_v18 = vadd.f32 %v2086_v17, %v2052_v43  ;;  %v2087_v25 = vmul.f32 0.044715, %v2081_v41 }
0x12aa   :  { %v2059_v9 = vpop.f32.mrb[88].mxu1 }
0x12ab   :  { %v2098_v28 = vmul.f32 0.7978846, %v2092_v18  ;;  %v2093_v48 = vadd.f32 %v2087_v25, %v2055_v14  ;;  %v2060_v22 = vadd.f32 %v2355_v1, %v2059_v9  ;;  %v2746_v31 = vpop.f32.mrb[89].mxu1 }
0x12ac   :  { %v2062_v12 = vpop.f32.mrb[90].mxu1 }
0x12ad   :  { %2979 = vtanh.f32 %v2098_v28  ;;  %v2099_v23 = vmul.f32 0.7978846, %v2093_v48  ;;  %v2076_v21 = vmul.f32 %v2060_v22, %v2060_v22  ;;  %v2063_v24 = vadd.f32 %v2355_v1, %v2062_v12  ;;  %v2747_v27 = vpop.f32.mrb[91].mxu1 }
0x12af   :  { %2981 = vtanh.f32 %v2099_v23  ;;  %v2082_v19 = vmul.f32 %v2076_v21, %v2060_v22  ;;  %v2077_v20 = vmul.f32 %v2063_v24, %v2063_v24 }
0x12b1   :  { %v2088_v16 = vmul.f32 0.044715, %v2082_v19  ;;  %v2083_v37 = vmul.f32 %v2077_v20, %v2063_v24 }
0x12b2   :  { %v2067_v54 = vpop.f32.mrb[92].mxu1 }
0x12b3   :  { %v2094_v39 = vadd.f32 %v2088_v16, %v2060_v22  ;;  %v2089_v29 = vmul.f32 0.044715, %v2083_v37  ;;  %v2068_v45 = vadd.f32 %v2355_v1, %v2067_v54  ;;  %v2750_v6 = vpop.f32.mrb[93].mxu1 }
0x12b4   :  { %v2070_v40 = vpop.f32.mrb[94].mxu1 }
0x12b5   :  { %v2100_v46 = vmul.f32 0.7978846, %v2094_v39  ;;  %v2095_v63 = vadd.f32 %v2089_v29, %v2063_v24  ;;  %v2078_v36 = vmul.f32 %v2068_v45, %v2068_v45  ;;  %v2071_v49 = vadd.f32 %v2355_v1, %v2070_v40  ;;  %v2751_v34 = vpop.f32.mrb[95].mxu1 }
0x12b7   :  { %v2980_v32 = vpop.eup %2979  ;;  %2983 = vtanh.f32 %v2100_v46  ;;  %v2101_v8 = vmul.f32 0.7978846, %v2095_v63  ;;  %v2084_v47 = vmul.f32 %v2078_v36, %v2068_v45  ;;  %v2079_v52 = vmul.f32 %v2071_v49, %v2071_v49 }
0x12b8   :  { %v2110_v42 = vadd.f32 1.0, %v2980_v32 }
0x12b9   :  { %v2982_v44 = vpop.eup %2981  ;;  %2985 = vtanh.f32 %v2101_v8  ;;  %v2090_v57 = vmul.f32 0.044715, %v2084_v47  ;;  %v2085_v61 = vmul.f32 %v2079_v52, %v2071_v49 }
0x12ba   :  { %v2116_v60 = vmul.f32 0.5, %v2110_v42  ;;  %v2111_v35 = vadd.f32 1.0, %v2982_v44 }
0x12bb   :  { %v2096_v62 = vadd.f32 %v2090_v57, %v2068_v45  ;;  %v2091_v55 = vmul.f32 0.044715, %v2085_v61 }
0x12bc   :  { %v2117_v30 = vmul.f32 0.5, %v2111_v35  ;;  %v2122_v5 = vmul.f32 %v2116_v60, %v2052_v43 }
0x12bd   :  { %v2102_v3 = vmul.f32 0.7978846, %v2096_v62  ;;  %v2097_v59 = vadd.f32 %v2091_v55, %v2071_v49 }
0x12be   :  { %v2123_v26 = vmul.f32 %v2117_v30, %v2055_v14 }
0x12bf   :  { %2987 = vtanh.f32 %v2102_v3  ;;  %v2103_v50 = vmul.f32 0.7978846, %v2097_v59 }
0x12c0   :  { %v2128_v1 = vpack.c.bf16 %v2123_v26, %v2122_v5 }
0x12c1   :  { %v2984_v10 = vpop.eup %2983  ;;  %2989 = vtanh.f32 %v2103_v50 }
0x12c2   :  { %2769 = vmatmul.mubr.bf16.vlgmr.msra.gmra.mrb[72].mxu0 %v2128_v1  ;;  %v2112_v11 = vadd.f32 1.0, %v2984_v10 }
0x12c3   :  { %v2986_v15 = vpop.eup %2985  ;;  %2772 = vmatprep.mubr.msk.bf16.mxu0 %vm2998_vm0, %v2997_v0 }
0x12c4   :  { %v2113_v51 = vadd.f32 1.0, %v2986_v15  ;;  %v2118_v58 = vmul.f32 0.5, %v2112_v11 }
0x12c6   :  { %v2119_v2 = vmul.f32 0.5, %v2113_v51  ;;  %v2124_v38 = vmul.f32 %v2118_v58, %v2060_v22  ;;  %v2386_v22 = vld [vmem:[%s3926_s9 + $0x1] ss:$0 sm:$0xff] }
0x12c8   :  { %v2125_v17 = vmul.f32 %v2119_v2, %v2063_v24 }
0x12c9   :  { %v2988_v41 = vpop.eup %2987 }
0x12ca   :  { %v2129_v18 = vpack.c.bf16 %v2125_v17, %v2124_v38  ;;  %v2114_v43 = vadd.f32 1.0, %v2988_v41 }
0x12cb   :  { %v2990_v14 = vpop.eup %2989 }
0x12cc   :  { %2773 = vmatmul.mubr.bf16.gmra.mrb[76].mxu0 %v2129_v18  ;;  %v2115_v25 = vadd.f32 1.0, %v2990_v14  ;;  %v2120_v9 = vmul.f32 0.5, %v2114_v43 }
0x12cd   :  { %2776 = vmatprep.mubr.msk.bf16.mxu0 %vm2998_vm0, %v2997_v0 }
0x12ce   :  { %v2121_v28 = vmul.f32 0.5, %v2115_v25  ;;  %v2126_v48 = vmul.f32 %v2120_v9, %v2068_v45 }
0x12d0   :  { %v2127_v31 = vmul.f32 %v2121_v28, %v2071_v49 }
0x12d2   :  { %v2130_v12 = vpack.c.bf16 %v2127_v31, %v2126_v48 }
0x12d4   :  { %2777 = vmatmul.mubr.bf16.gmra.mrb[80].mxu0 %v2130_v12 }
0x1395   :  { %v2230_v23 = vpop.f32.mrb[72].mxu0 }
0x1396   :  { %v2253_v21 = vadd.f32 %v2230_v23, %v3786_v13  ;;  %v2770_v24 = vpop.f32.mrb[73].mxu0 }
0x1397   :  { %v2233_v27 = vpop.f32.mrb[74].mxu0 }
0x1398   :  { %v2267_v19 = vadd.f32 %v2386_v22, %v2253_v21  ;;  %v2254_v20 = vadd.f32 %v2233_v27, %v3790_v33  ;;  %v2771_v16 = vpop.f32.mrb[75].mxu0 }
0x139a   :  { %2273 = vst.msk [vmem:[%s3927_s10] sm:$0xff] %vm193_vm1, %v2267_v19  ;;  %v2268_v0 = vadd.f32 %v2386_v22, %v2254_v20 }
0x139c   :  { %2274 = vst.msk [vmem:[%s3927_s10 + $0x8] sm:$0xff] %vm193_vm1, %v2268_v0 }
0x139f   :  { %v2238_v37 = vpop.f32.mrb[76].mxu0 }
0x13a0   :  { %v2255_v13 = vadd.f32 %v2238_v37, %v3798_v53  ;;  %v2774_v54 = vpop.f32.mrb[77].mxu0 }
0x13a1   :  { %v2241_v39 = vpop.f32.mrb[78].mxu0 }
0x13a2   :  { %v2269_v29 = vadd.f32 %v2386_v22, %v2255_v13  ;;  %v2256_v33 = vadd.f32 %v2241_v39, %v3802_v56  ;;  %v2775_v45 = vpop.f32.mrb[79].mxu0 }
0x13a4   :  { %2275 = vst.msk [vmem:[%s3927_s10 + $0x10] sm:$0xff] %vm193_vm1, %v2269_v29  ;;  %v2270_v6 = vadd.f32 %v2386_v22, %v2256_v33 }
0x13a6   :  { %2276 = vst.msk [vmem:[%s3927_s10 + $0x18] sm:$0xff] %vm193_vm1, %v2270_v6 }
0x13a7   :  { %v2246_v40 = vpop.f32.mrb[80].mxu0 }
0x13a8   :  { %v2257_v53 = vadd.f32 %v2246_v40, %v3810_v4  ;;  %v2778_v46 = vpop.f32.mrb[81].mxu0 }
0x13a9   :  { %v2249_v63 = vpop.f32.mrb[82].mxu0 }
0x13aa   :  { %v2271_v36 = vadd.f32 %v2386_v22, %v2257_v53  ;;  %v2258_v56 = vadd.f32 %v2249_v63, %v3814_v7  ;;  %v2779_v49 = vpop.f32.mrb[83].mxu0 }
0x13ac   :  { %2277 = vst.msk [vmem:[%s3927_s10 + $0x20] sm:$0xff] %vm193_vm1, %v2271_v36  ;;  %v2272_v34 = vadd.f32 %v2386_v22, %v2258_v56 }
0x13ae   :  { %2278 = vst.msk [vmem:[%s3927_s10 + $0x28] sm:$0xff] %vm193_vm1, %v2272_v34 }

</bundles_post_ra>
